<compile_context>
chip_gen: v6e
topology: v6e:2x2x1
jax: 0.10.0
libtpu: 0.0.40
codegen_flags: <defaults>
</compile_context>

<pallas_src>
import functools

import jax
import jax.numpy as jnp
from jax.experimental import pallas as pl
from jax.experimental.pallas import tpu as pltpu


def _round_up(x, m):
    return ((x + m - 1) // m) * m


def _gravity_tile_kernel(feat_ref, featT_ref, sqr_ref, sqc_ref, mass_ref,
                         adj_ref, *, pop_bias, cols_resident):
    i = pl.program_id(0)
    j = pl.program_id(1)
    tm, tn = adj_ref.shape

    if cols_resident:
        # featT / sq_col hold the full (padded) column range in VMEM; pick the
        # lane-aligned window for this tile.
        c0 = pl.multiple_of(j * tn, 128)
        featT = featT_ref[:, pl.ds(c0, tn)]          # (Dpad, TN)
        sqc = sqc_ref[:, pl.ds(c0, tn)]              # (1, TN)
    else:
        featT = featT_ref[...]
        sqc = sqc_ref[...]

    # Gram matrix on the MXU: (TM, Dpad) @ (Dpad, TN) -> f32 (TM, TN).
    gram = jax.lax.dot_general(
        feat_ref[...], featT, (((1,), (0,)), ((), ())),
        preferred_element_type=jnp.float32,
        precision=jax.lax.Precision.HIGHEST)

    # ||a - b||^2 = ||a||^2 + ||b||^2 - 2 a.b  (row/col norms precomputed once
    # in the wrapper).
    d2 = sqr_ref[...] + sqc - 2.0 * gram
    dist = jnp.sqrt(jnp.maximum(d2, 0.0))

    # mass broadcast along columns (z_mass.repeat(1, N)), then sigmoid as a
    # single EUP transcendental: sigmoid(x) = 0.5 * tanh(0.5 * x) + 0.5.
    logits = mass_ref[...] - pop_bias * dist
    adj_ref[...] = (0.5 * jnp.tanh(0.5 * logits) + 0.5).astype(adj_ref.dtype)

    # torch.cdist(z, z) is exactly 0 on the diagonal; the gram expansion above
    # is not (catastrophic cancellation), so pin it.  Only diagonal grid tiles
    # can contain global-diagonal elements because tm == tn.
    @pl.when(i == j)
    def _():
        rows = jax.lax.broadcasted_iota(jnp.int32, (tm, tn), 0)
        cols = jax.lax.broadcasted_iota(jnp.int32, (tm, tn), 1)
        diag_val = (0.5 * jnp.tanh(0.5 * mass_ref[...]) + 0.5).astype(adj_ref.dtype)
        adj_ref[...] = jnp.where(rows == cols, diag_val, adj_ref[...])


def gravity_inspired_decoder(z, sampled_nodes, *, dropout=0.0,
                             normalization=True, pop_bias=1.0, training=False,
                             tile=512):
    """Matches GravityInspiredDecoder.forward (eval mode, act=sigmoid)."""
    # F.dropout is the identity in eval mode.
    # TODO(synk): training-mode dropout (pltpu.prng_* mask) not implemented.
    del dropout, training

    z_s = jnp.take(z, sampled_nodes, axis=0).astype(jnp.float32)
    n, d = z_s.shape
    feat = z_s[:, :d - 1]                        # (n, D-1)
    mass = z_s[:, d - 1:d]                       # (n, 1)

    if normalization:
        # F.normalize(x, p=2, dim=1): x / max(||x||_2, eps), eps = 1e-12.
        nrm = jnp.sqrt(jnp.sum(feat * feat, axis=1, keepdims=True))
        feat = feat / jnp.maximum(nrm, 1e-12)
    sq = jnp.sum(feat * feat, axis=1, keepdims=True)   # (n, 1)

    # Square lane-dense output tiles (multiple of 128); pad N so every block is
    # full.  Feature dim padded only to the f32 sublane tile (8).  Padding is
    # zeros, which changes neither norms nor the gram matrix; padded rows/cols
    # are sliced off at the end.
    tm = tn = min(int(tile), _round_up(max(n, 1), 128))
    n_pad = _round_up(max(n, 1), tm)
    d_pad = _round_up(max(d - 1, 1), 8)

    feat_p = jnp.zeros((n_pad, d_pad), jnp.float32).at[:n, :d - 1].set(feat)
    featT_p = feat_p.T                           # (d_pad, n_pad), staged once
    sq_row = jnp.zeros((n_pad, 1), jnp.float32).at[:n].set(sq)
    sq_col = sq_row.T                            # (1, n_pad)
    mass_p = jnp.zeros((n_pad, 1), jnp.float32).at[:n].set(mass)

    # Keep featT / sq_col fully VMEM-resident (single DMA, constant block
    # index) when they are small; fall back to per-tile streaming otherwise.
    cols_resident = (d_pad + 1) * n_pad * 4 <= 2 * 1024 * 1024
    if cols_resident:
        featT_spec = pl.BlockSpec((d_pad, n_pad), lambda i, j: (0, 0))
        sqc_spec = pl.BlockSpec((1, n_pad), lambda i, j: (0, 0))
    else:
        featT_spec = pl.BlockSpec((d_pad, tn), lambda i, j: (0, j))
        sqc_spec = pl.BlockSpec((1, tn), lambda i, j: (0, j))

    kernel = functools.partial(_gravity_tile_kernel, pop_bias=float(pop_bias),
                               cols_resident=cols_resident)
    adj_p = pl.pallas_call(
        kernel,
        out_shape=jax.ShapeDtypeStruct((n_pad, n_pad), jnp.float32),
        grid_spec=pltpu.PrefetchScalarGridSpec(
            num_scalar_prefetch=0,
            grid=(n_pad // tm, n_pad // tn),
            in_specs=[
                pl.BlockSpec((tm, d_pad), lambda i, j: (i, 0)),   # feat rows
                featT_spec,                                       # feat^T cols
                pl.BlockSpec((tm, 1), lambda i, j: (i, 0)),       # ||a||^2
                sqc_spec,                                         # ||b||^2
                pl.BlockSpec((tm, 1), lambda i, j: (i, 0)),       # mass
            ],
            out_specs=pl.BlockSpec((tm, tn), lambda i, j: (i, j)),
        ),
        compiler_params=pltpu.CompilerParams(
            dimension_semantics=("parallel", "parallel"),
            vmem_limit_bytes=48 * 1024 * 1024,
        ),
    )(feat_p, featT_p, sq_row, sq_col, mass_p)
    return adj_p[:n, :n]


def _reference(z, sampled_nodes, normalization=True, pop_bias=1.0):
    z_s = jnp.take(z, sampled_nodes, axis=0)
    d = z_s.shape[1]
    mass = z_s[:, d - 1:d]
    feat = z_s[:, :d - 1]
    if normalization:
        nrm = jnp.maximum(jnp.linalg.norm(feat, axis=1, keepdims=True), 1e-12)
        feat = feat / nrm
    diff = feat[:, None, :] - feat[None, :, :]
    dist = jnp.sqrt(jnp.sum(diff * diff, axis=-1))
    return jax.nn.sigmoid(mass - pop_bias * dist)


if __name__ == "__main__":
    key = jax.random.PRNGKey(0)
    k1, k2, k3 = jax.random.split(key, 3)

    # Case 1: tiny toy shapes (16 nodes, embed_dim=8, 8 sampled) -> 1x1 grid.
    z1 = jax.random.normal(k1, (16, 8), dtype=jnp.float32)
    s1 = jnp.array([0, 2, 4, 6, 8, 10, 12, 14], dtype=jnp.int32)
    adj1 = jax.block_until_ready(
        gravity_inspired_decoder(z1, s1, dropout=0.0, normalization=True,
                                 pop_bias=1.0, training=False))
    ref1 = _reference(z1, s1)
    assert adj1.shape == (8, 8)
    assert jnp.allclose(adj1, ref1, atol=1e-5, rtol=1e-5), "case 1 mismatch"

    # Case 2: multi-tile 2x2 grid of 128x128 tiles with ragged N=200
    # (exercises the resident-column dynamic slice and the diagonal pl.when).
    z2 = jax.random.normal(k2, (512, 8), dtype=jnp.float32)
    s2 = jax.random.permutation(k3, 512)[:200].astype(jnp.int32)
    adj2 = jax.block_until_ready(
        gravity_inspired_decoder(z2, s2, normalization=True, pop_bias=1.0,
                                 tile=128))
    ref2 = _reference(z2, s2)
    assert adj2.shape == (200, 200)
    assert jnp.allclose(adj2, ref2, atol=1e-5, rtol=1e-5), "case 2 mismatch"

    # Case 3: normalization=False, non-default pop_bias.
    adj3 = jax.block_until_ready(
        gravity_inspired_decoder(z1, s1, normalization=False, pop_bias=0.5))
    ref3 = _reference(z1, s1, normalization=False, pop_bias=0.5)
    assert jnp.allclose(adj3, ref3, atol=1e-5, rtol=1e-5), "case 3 mismatch"

    print("KERNEL_OK")
</pallas_src>

<mosaic_0001>
module attributes {stable_mosaic.version = 11 : i64} {
  func.func @_gravity_tile_kernel(%arg0: i32, %arg1: i32, %arg2: memref<128x8xf32, #tpu.memory_space<vmem>>, %arg3: memref<8x128xf32, #tpu.memory_space<vmem>>, %arg4: memref<128x1xf32, #tpu.memory_space<vmem>>, %arg5: memref<1x128xf32, #tpu.memory_space<vmem>>, %arg6: memref<128x1xf32, #tpu.memory_space<vmem>>, %arg7: memref<128x128xf32, #tpu.memory_space<vmem>>) attributes {dimension_semantics = [#tpu.dimension_semantics<parallel>, #tpu.dimension_semantics<parallel>], iteration_bounds = array<i64: 1, 1>, scalar_prefetch = 0 : i64, scratch_operands = 0 : i64, tpu.core_type = #tpu.core_type<tc>, window_params = [{transform_indices = @transform_0, window_bounds = array<i64: 128, 8>}, {pipeline_mode = #tpu.pipeline_mode<synchronous>, transform_indices = @transform_1, window_bounds = array<i64: 8, 128>}, {transform_indices = @transform_2, window_bounds = array<i64: 128, 1>}, {pipeline_mode = #tpu.pipeline_mode<synchronous>, transform_indices = @transform_3, window_bounds = array<i64: 1, 128>}, {transform_indices = @transform_4, window_bounds = array<i64: 128, 1>}, {transform_indices = @transform_5, window_bounds = array<i64: 128, 128>}]} {
    %c128_i32 = arith.constant 128 : i32
    %0 = arith.muli %arg1, %c128_i32 : i32
    %1 = tpu.assume_multiple %0, 128 : i32
    %c0 = arith.constant 0 : index
    %2 = arith.index_cast %1 : i32 to index
    %3 = vector.load %arg3[%c0, %2] : memref<8x128xf32, #tpu.memory_space<vmem>>, vector<8x128xf32>
    %c0_0 = arith.constant 0 : index
    %4 = arith.index_cast %1 : i32 to index
    %5 = vector.load %arg5[%c0_0, %4] : memref<1x128xf32, #tpu.memory_space<vmem>>, vector<1x128xf32>
    %c0_1 = arith.constant 0 : index
    %c0_2 = arith.constant 0 : index
    %6 = vector.load %arg2[%c0_1, %c0_2] : memref<128x8xf32, #tpu.memory_space<vmem>>, vector<128x8xf32>
    %cst = arith.constant dense<0.000000e+00> : vector<128x128xf32>
    %7 = tpu.matmul %6, %3, %cst {dimension_numbers = #tpu.dot_dimension_numbers<[1], [0], [0], [1], [0, 0, 1, 1], [], []>, precision = #tpu.contract_precision<fp32>} : vector<128x8xf32>, vector<8x128xf32>, vector<128x128xf32> -> vector<128x128xf32>
    %c0_3 = arith.constant 0 : index
    %c0_4 = arith.constant 0 : index
    %8 = vector.load %arg4[%c0_3, %c0_4] : memref<128x1xf32, #tpu.memory_space<vmem>>, vector<128x1xf32>
    %9 = vector.broadcast %8 : vector<128x1xf32> to vector<128x128xf32>
    %10 = vector.broadcast %5 : vector<1x128xf32> to vector<128x128xf32>
    %11 = arith.addf %9, %10 : vector<128x128xf32>
    %cst_5 = arith.constant 2.000000e+00 : f32
    %12 = vector.broadcast %cst_5 : f32 to vector<128x128xf32>
    %13 = arith.mulf %12, %7 : vector<128x128xf32>
    %14 = arith.subf %11, %13 : vector<128x128xf32>
    %cst_6 = arith.constant 0.000000e+00 : f32
    %15 = vector.broadcast %cst_6 : f32 to vector<128x128xf32>
    %16 = arith.maximumf %14, %15 : vector<128x128xf32>
    %17 = math.sqrt %16 : vector<128x128xf32>
    %c0_7 = arith.constant 0 : index
    %c0_8 = arith.constant 0 : index
    %18 = vector.load %arg6[%c0_7, %c0_8] : memref<128x1xf32, #tpu.memory_space<vmem>>, vector<128x1xf32>
    %cst_9 = arith.constant 1.000000e+00 : f32
    %19 = vector.broadcast %cst_9 : f32 to vector<128x128xf32>
    %20 = arith.mulf %19, %17 : vector<128x128xf32>
    %21 = vector.broadcast %18 : vector<128x1xf32> to vector<128x128xf32>
    %22 = arith.subf %21, %20 : vector<128x128xf32>
    %cst_10 = arith.constant 5.000000e-01 : f32
    %23 = vector.broadcast %cst_10 : f32 to vector<128x128xf32>
    %24 = arith.mulf %23, %22 : vector<128x128xf32>
    %25 = math.tanh %24 : vector<128x128xf32>
    %cst_11 = arith.constant 5.000000e-01 : f32
    %26 = vector.broadcast %cst_11 : f32 to vector<128x128xf32>
    %27 = arith.mulf %26, %25 : vector<128x128xf32>
    %cst_12 = arith.constant 5.000000e-01 : f32
    %28 = vector.broadcast %cst_12 : f32 to vector<128x128xf32>
    %29 = arith.addf %27, %28 : vector<128x128xf32>
    %c0_13 = arith.constant 0 : index
    %c0_14 = arith.constant 0 : index
    %30 = vector.load %arg7[%c0_13, %c0_14] : memref<128x128xf32, #tpu.memory_space<vmem>>, vector<128x128xf32>
    tpu.vector_store %arg7[%c0_13, %c0_14], %29 {strides = array<i32>} : memref<128x128xf32, #tpu.memory_space<vmem>>, vector<128x128xf32>,
    %31 = arith.cmpi eq, %arg0, %arg1 : i32
    %32 = arith.extui %31 : i1 to i32
    %c0_i32 = arith.constant 0 : i32
    %33 = arith.cmpi ne, %32, %c0_i32 : i32
    scf.if %33 {
      %34 = tpu.iota {dimensions = array<i32: 0>} : vector<128x128xi32>
      %35 = tpu.iota {dimensions = array<i32: 1>} : vector<128x128xi32>
      %c0_15 = arith.constant 0 : index
      %c0_16 = arith.constant 0 : index
      %36 = vector.load %arg6[%c0_15, %c0_16] : memref<128x1xf32, #tpu.memory_space<vmem>>, vector<128x1xf32>
      %cst_17 = arith.constant 5.000000e-01 : f32
      %37 = vector.broadcast %cst_17 : f32 to vector<128x1xf32>
      %38 = arith.mulf %37, %36 : vector<128x1xf32>
      %39 = math.tanh %38 : vector<128x1xf32>
      %cst_18 = arith.constant 5.000000e-01 : f32
      %40 = vector.broadcast %cst_18 : f32 to vector<128x1xf32>
      %41 = arith.mulf %40, %39 : vector<128x1xf32>
      %cst_19 = arith.constant 5.000000e-01 : f32
      %42 = vector.broadcast %cst_19 : f32 to vector<128x1xf32>
      %43 = arith.addf %41, %42 : vector<128x1xf32>
      %44 = arith.cmpi eq, %34, %35 : vector<128x128xi32>
      %c0_20 = arith.constant 0 : index
      %c0_21 = arith.constant 0 : index
      %45 = vector.load %arg7[%c0_20, %c0_21] : memref<128x128xf32, #tpu.memory_space<vmem>>, vector<128x128xf32>
      %46 = vector.shape_cast %43 : vector<128x1xf32> to vector<128x1xf32>
      %47 = vector.broadcast %46 : vector<128x1xf32> to vector<128x128xf32>
      %48 = arith.select %44, %47, %45 : vector<128x128xi1>, vector<128x128xf32>
      %c0_22 = arith.constant 0 : index
      %c0_23 = arith.constant 0 : index
      %49 = vector.load %arg7[%c0_22, %c0_23] : memref<128x128xf32, #tpu.memory_space<vmem>>, vector<128x128xf32>
      tpu.vector_store %arg7[%c0_22, %c0_23], %48 {strides = array<i32>} : memref<128x128xf32, #tpu.memory_space<vmem>>, vector<128x128xf32>,
    } else {
    }
    return
  }
  func.func @transform_0(%arg0: i32, %arg1: i32) -> (i32, i32) {
    %c0_i32 = arith.constant 0 : i32
    %c0_i32_0 = arith.constant 0 : i32
    return %arg0, %c0_i32 : i32, i32
  }
  func.func @transform_1(%arg0: i32, %arg1: i32) -> (i32, i32) {
    %c0_i32 = arith.constant 0 : i32
    %c0_i32_0 = arith.constant 0 : i32
    %c0_i32_1 = arith.constant 0 : i32
    return %c0_i32, %c0_i32_0 : i32, i32
  }
  func.func @transform_2(%arg0: i32, %arg1: i32) -> (i32, i32) {
    %c0_i32 = arith.constant 0 : i32
    %c0_i32_0 = arith.constant 0 : i32
    return %arg0, %c0_i32 : i32, i32
  }
  func.func @transform_3(%arg0: i32, %arg1: i32) -> (i32, i32) {
    %c0_i32 = arith.constant 0 : i32
    %c0_i32_0 = arith.constant 0 : i32
    %c0_i32_1 = arith.constant 0 : i32
    return %c0_i32, %c0_i32_0 : i32, i32
  }
  func.func @transform_4(%arg0: i32, %arg1: i32) -> (i32, i32) {
    %c0_i32 = arith.constant 0 : i32
    %c0_i32_0 = arith.constant 0 : i32
    return %arg0, %c0_i32 : i32, i32
  }
  func.func @transform_5(%arg0: i32, %arg1: i32) -> (i32, i32) {
    %c0_i32 = arith.constant 0 : i32
    return %arg0, %arg1 : i32, i32
  }
}

</mosaic_0001>

<bundles_post_ra>
// kernel: tpu_custom_call.1
= control target key start
LH: loop header
LB: loop body
LE: loop exit
PB: predicated region body
PF: predicated region fallthrough
CT: control target
= control target key end

     0   :  { %vm44_vm0 = vcmask 64512   ;;  %v2302_v9 = vmov 0   ;;  %s3294_s0 = inlined_call_operand.vmem [shape: f32[128,8], index: 0, kind: input, shape index: {}]   ;;  %s3295_s1 = inlined_call_operand.vmem [shape: f32[8,128], index: 1, kind: input, shape index: {}]   ;;  %s3296_s2 = inlined_call_operand.vmem [shape: f32[128,1], index: 2, kind: input, shape index: {}]   ;;  %s3297_s3 = inlined_call_operand.vmem [shape: f32[1,128], index: 3, kind: input, shape index: {}]   ;;  %s3298_s4 = inlined_call_operand.vmem [shape: f32[128,1], index: 4, kind: input, shape index: {}]   ;;  %s3299_s5 = inlined_call_operand.hbm [shape: f32[128,128], index: 5, kind: output, shape index: {}]  }
   0x1   :  { %v25_v0 = vld [vmem:[%s3295_s1] sm:$0xff]  ;;  %v29_v2 = vld [vmem:[%s3294_s0 + $0x8] sm:$0xff]  ;;  %v30_v6 = vld [vmem:[%s3294_s0 + $0x10] sm:$0xff]  ;;  %2183 = vset.pattern.permute.xlu1 %v2302_v9  ;;  %2182 = vset.pattern.permute.xlu0 %v2302_v9 }
   0x2   :  { %v28_v1 = vld [vmem:[%s3294_s0] sm:$0xff]  ;;  %v2345_v3 = vand.u32 4294901760, %v25_v0  ;;  %v49_v5 = vsel %vm44_vm0, %v29_v2, 0  ;;  %v31_v7 = vld [vmem:[%s3294_s0 + $0x18] sm:$0xff]  ;;  %v52_v12 = vsel %vm44_vm0, %v30_v6, 0  ;;  %v33_v14 = vld [vmem:[%s3294_s0 + $0x28] sm:$0xff] }
   0x3   :  { %v46_v4 = vsel %vm44_vm0, %v28_v1, 0  ;;  %v32_v8 = vld [vmem:[%s3294_s0 + $0x20] sm:$0xff]  ;;  %v2360_v11 = vand.u32 4294901760, %v49_v5  ;;  %v55_v13 = vsel %vm44_vm0, %v31_v7, 0  ;;  %v2371_v16 = vand.u32 4294901760, %v52_v12  ;;  %v34_v19 = vld [vmem:[%s3294_s0 + $0x30] sm:$0xff] }
   0x4   :  { %v2358_v10 = vand.u32 4294901760, %v46_v4  ;;  %2022 = vmatprep.subr.mxu0 %v2345_v3  ;;  %v2369_v15 = vsub.f32 %v25_v0, %v2345_v3  ;;  %v2373_v17 = vand.u32 4294901760, %v55_v13  ;;  %v58_v18 = vsel %vm44_vm0, %v32_v8, 0  ;;  %v1186_v32 = vld [vmem:[%s3296_s2 + $0x10] sm:$0xff]  ;;  %v1184_v33 = vld [vmem:[%s3296_s2] sm:$0xff]  ;;  %v35_v42 = vld [vmem:[%s3294_s0 + $0x38] sm:$0xff] }
   0x5   :  { %2023 = vmatpush3.msra.mxu0 %v2345_v3  ;;  %v2385_v21 = vsub.f32 %v49_v5, %v2360_v11  ;;  %v2387_v22 = vand.u32 4294901760, %v58_v18  ;;  %v61_v23 = vsel %vm44_vm0, %v33_v14, 0  ;;  %v2395_v25 = vsub.f32 %v52_v12, %v2371_v16  ;;  %1212 = vperm.xlu1 %2183, %v1186_v32   ;;  %v1187_v43 = vld [vmem:[%s3296_s2 + $0x18] sm:$0xff]  ;;  %v36_v48 = vld [vmem:[%s3294_s0 + $0x40] sm:$0xff]  ;;  %v37_v53 = vld [vmem:[%s3294_s0 + $0x48] sm:$0xff] }
   0x6   :  { %v2381_v20 = vsub.f32 %v46_v4, %v2358_v10  ;;  %2050 = vmatprep.mubr.f32.mxu1 %v2358_v10  ;;  %v2391_v24 = vand.u32 4294901760, %v2369_v15  ;;  %2074 = vmatprep.subr.mxu0 %v2369_v15  ;;  %v2398_v26 = vsub.f32 %v55_v13, %v2373_v17  ;;  %v2400_v27 = vand.u32 4294901760, %v61_v23  ;;  %v38_v54 = vld [vmem:[%s3294_s0 + $0x50] sm:$0xff]  ;;  %v39_v59 = vld [vmem:[%s3294_s0 + $0x58] sm:$0xff]  ;;  %v40_v0 = vld [vmem:[%s3294_s0 + $0x60] sm:$0xff] }
   0x7   :  { %v171_v29 = vand.u32 4294901760, %v2385_v21  ;;  %v2405_v30 = vsub.f32 %v58_v18, %v2387_v22  ;;  %v64_v31 = vsel %vm44_vm0, %v34_v19, 0  ;;  %v181_v35 = vand.u32 4294901760, %v2395_v25  ;;  %1202 = vperm.xlu0 %2182, %v1184_v33   ;;  %v41_v1 = vld [vmem:[%s3294_s0 + $0x68] sm:$0xff]  ;;  %v42_v19 = vld [vmem:[%s3294_s0 + $0x70] sm:$0xff] }
   0x8   :  { %v161_v28 = vand.u32 4294901760, %v2381_v20  ;;  %v353_v34 = vsub.f32 %v2369_v15, %v2391_v24  ;;  %v191_v36 = vand.u32 4294901760, %v2398_v26  ;;  %v2419_v37 = vsub.f32 %v61_v23, %v2400_v27 }
   0x9   :  { %v172_v39 = vsub.f32 %v2385_v21, %v171_v29  ;;  %v201_v40 = vand.u32 4294901760, %v2405_v30  ;;  %v2428_v41 = vand.u32 4294901760, %v64_v31  ;;  %v182_v45 = vsub.f32 %v2395_v25, %v181_v35  ;;  %1217 = vperm.xlu1 %2183, %v1187_v43   ;;  %v1185_v43 = vld [vmem:[%s3296_s2 + $0x8] sm:$0xff] }
   0xa   :  { %v162_v38 = vsub.f32 %v2381_v20, %v161_v28  ;;  %v354_v44 = vand.u32 4294901760, %v353_v34  ;;  %v192_v46 = vsub.f32 %v2398_v26, %v191_v36  ;;  %v211_v47 = vand.u32 4294901760, %v2419_v37 }
   0xb   :  { %v173_v50 = vand.u32 4294901760, %v172_v39  ;;  %v202_v51 = vsub.f32 %v2405_v30, %v201_v40  ;;  %v2450_v52 = vsub.f32 %v64_v31, %v2428_v41  ;;  %v183_v55 = vand.u32 4294901760, %v182_v45 }
   0xc   :  { %v163_v49 = vand.u32 4294901760, %v162_v38  ;;  %2048 = vmatprep.subr.mxu1 %v354_v44  ;;  %v193_v56 = vand.u32 4294901760, %v192_v46  ;;  %v212_v57 = vsub.f32 %v2419_v37, %v211_v47  ;;  %v67_v58 = vsel %vm44_vm0, %v35_v42, 0 }
   0xd   :  { %2049 = vmatpush3.msra.mxu1 %v354_v44  ;;  %v203_v60 = vand.u32 4294901760, %v202_v51  ;;  %v221_v61 = vand.u32 4294901760, %v2450_v52  ;;  %v2466_v62 = vand.u32 4294901760, %v67_v58  ;;  %v70_v63 = vsel %vm44_vm0, %v36_v48, 0  ;;  %v1189_v44 = vld [vmem:[%s3296_s2 + $0x28] sm:$0xff] }
   0xe   :  { %2024 = vmatprep.mubr.f32.mxu0 %v163_v49  ;;  %2051 = vmatmul.mubr.f32.vlgmr.msra.gmra.mxu1 %v2360_v11  ;;  %v213_v2 = vand.u32 4294901760, %v212_v57  ;;  %v2476_v4 = vand.u32 4294901760, %v70_v63  ;;  %v73_v5 = vsel %vm44_vm0, %v37_v53, 0  ;;  %v76_v6 = vsel %vm44_vm0, %v38_v54, 0  ;;  %v43_v54 = vld [vmem:[%s3294_s0 + $0x78] sm:$0xff] }
   0xf   :  { %2025 = vmatmul.mubr.f32.vlgmr.msra.gmra.mxu0 %v173_v50  ;;  %2100 = vmatprep.subr.mxu1 %v2345_v3  ;;  %v222_v7 = vsub.f32 %v2450_v52, %v221_v61  ;;  %v2486_v8 = vsub.f32 %v67_v58, %v2466_v62  ;;  %v2488_v9 = vand.u32 4294901760, %v73_v5  ;;  %v2490_v12 = vand.u32 4294901760, %v76_v6 }
  0x10   :  { %2075 = vmatpush3.msra.mxu0 %v2369_v15  ;;  %2101 = vmatpush3.msra.mxu1 %v2345_v3  ;;  %v2494_v13 = vsub.f32 %v70_v63, %v2476_v4  ;;  %v79_v14 = vsel %vm44_vm0, %v39_v59, 0  ;;  %v82_v15 = vsel %vm44_vm0, %v40_v0, 0  ;;  %v85_v18 = vsel %vm44_vm0, %v41_v1, 0 }
  0x11   :  { %2027 = vmatprep.mubr.f32.mxu0 %v183_v55  ;;  %2053 = vmatprep.mubr.f32.mxu1 %v2371_v16  ;;  %v223_v23 = vand.u32 4294901760, %v222_v7  ;;  %v231_v31 = vand.u32 4294901760, %v2486_v8  ;;  %v2505_v32 = vsub.f32 %v73_v5, %v2488_v9  ;;  %v2508_v33 = vsub.f32 %v76_v6, %v2490_v12 }
  0x12   :  { %2126 = vmatprep.subr.mxu0 %v2391_v24  ;;  %2054 = vmatmul.mubr.f32.gmra.mxu1 %v2373_v17  ;;  %v241_v34 = vand.u32 4294901760, %v2494_v13  ;;  %v2513_v38 = vand.u32 4294901760, %v79_v14  ;;  %v2515_v39 = vand.u32 4294901760, %v82_v15  ;;  %v2517_v42 = vand.u32 4294901760, %v85_v18 }
  0x13   :  { %2028 = vmatmul.mubr.f32.gmra.mxu0 %v193_v56  ;;  %2056 = vmatprep.mubr.f32.mxu1 %v2387_v22  ;;  %v232_v45 = vsub.f32 %v2486_v8, %v231_v31  ;;  %v251_v46 = vand.u32 4294901760, %v2505_v32  ;;  %v261_v48 = vand.u32 4294901760, %v2508_v33  ;;  %v88_v49 = vsel %vm44_vm0, %v42_v19, 0 }
  0x14   :  { %2030 = vmatprep.mubr.f32.mxu0 %v203_v60  ;;  %v242_v50 = vsub.f32 %v2494_v13, %v241_v34  ;;  %v2536_v51 = vsub.f32 %v79_v14, %v2513_v38  ;;  %v2539_v53 = vsub.f32 %v82_v15, %v2515_v39  ;;  %2152 = vmatprep.subr.mxu1 %v2345_v3 }
  0x15   :  { %10 = vsyncpa [#allocation3], 0  ;;  %v2546_v55 = vsub.f32 %v85_v18, %v2517_v42  ;;  %v2548_v56 = vand.u32 4294901760, %v88_v49  ;;  %1207 = vperm.xlu0 %2182, %v1185_v43   ;;  %1227 = vperm.xlu1 %2183, %v1189_v44   ;;  %v233_v57 = vand.u32 4294901760, %v232_v45  ;;  %v252_v58 = vsub.f32 %v2505_v32, %v251_v46  ;;  %v1188_v63 = vld [vmem:[%s3296_s2 + $0x20] sm:$0xff]  ;;  %v1191_v0 = vld [vmem:[%s3296_s2 + $0x38] sm:$0xff] }
  0x16   :  { %2057 = vmatmul.mubr.f32.gmra.mxu1 %v2400_v27  ;;  %v262_v59 = vsub.f32 %v2508_v33, %v261_v48  ;;  %v271_v60 = vand.u32 4294901760, %v2536_v51  ;;  %v243_v1 = vand.u32 4294901760, %v242_v50  ;;  %v91_v6 = vsel %vm44_vm0, %v43_v54, 0  ;;  %v1193_v43 = vld [vmem:[%s3296_s2 + $0x48] sm:$0xff] }
  0x17   :  { %2031 = vmatmul.mubr.f32.gmra.mxu0 %v213_v2  ;;  %2059 = vmatprep.mubr.f32.mxu1 %v2428_v41  ;;  %v281_v2 = vand.u32 4294901760, %v2539_v53  ;;  %v2567_v5 = vsub.f32 %v88_v49, %v2548_v56  ;;  %v2570_v7 = vand.u32 4294901760, %v91_v6  ;;  %v253_v14 = vand.u32 4294901760, %v252_v58  ;;  %v1192_v58 = vld [vmem:[%s3296_s2 + $0x40] sm:$0xff] }
  0x18   :  { %2033 = vmatprep.mubr.f32.mxu0 %v223_v23  ;;  %v272_v15 = vsub.f32 %v2536_v51, %v271_v60  ;;  %v291_v18 = vand.u32 4294901760, %v2546_v55  ;;  %v1190_v23 = vld [vmem:[%s3296_s2 + $0x30] sm:$0xff]  ;;  %v263_v44 = vand.u32 4294901760, %v262_v59  ;;  %v1195_v59 = vld [vmem:[%s3296_s2 + $0x58] sm:$0xff] }
  0x19   :  { %1222 = vperm.xlu0 %2182, %v1188_v63   ;;  %1237 = vperm.xlu1 %2183, %v1191_v0   ;;  %v2578_v19 = vsub.f32 %v91_v6, %v2570_v7  ;;  %v282_v45 = vsub.f32 %v2539_v53, %v281_v2  ;;  %v301_v49 = vand.u32 4294901760, %v2567_v5 }
  0x1a   :  { %2060 = vmatmul.mubr.f32.gmra.mxu1 %v2466_v62  ;;  %v273_v50 = vand.u32 4294901760, %v272_v15  ;;  %v292_v54 = vsub.f32 %v2546_v55, %v291_v18  ;;  %v1197_v15 = vld [vmem:[%s3296_s2 + $0x68] sm:$0xff] }
  0x1b   :  { %2034 = vmatmul.mubr.f32.gmra.mxu0 %v233_v57  ;;  %2062 = vmatprep.mubr.f32.mxu1 %v2476_v4  ;;  %v311_v57 = vand.u32 4294901760, %v2578_v19  ;;  %v283_v63 = vand.u32 4294901760, %v282_v45  ;;  %v302_v0 = vsub.f32 %v2567_v5, %v301_v49  ;;  %v1199_v45 = vld [vmem:[%s3296_s2 + $0x78] sm:$0xff] }
  0x1c   :  { %2036 = vmatprep.mubr.f32.mxu0 %v243_v1  ;;  %v293_v1 = vand.u32 4294901760, %v292_v54  ;;  %v1463_v54 = vld [vmem:[%s3298_s4 + $0x8] sm:$0xff] }
  0x1d   :  { %1232 = vperm.xlu0 %2182, %v1190_v23   ;;  %1247 = vperm.xlu1 %2183, %v1193_v43   ;;  %v312_v6 = vsub.f32 %v2578_v19, %v311_v57  ;;  %v303_v23 = vand.u32 4294901760, %v302_v0 }
  0x1e   :  { %2063 = vmatmul.mubr.f32.gmra.mxu1 %v2488_v9 }
  0x1f   :  { %2037 = vmatmul.mubr.f32.gmra.mxu0 %v253_v14  ;;  %2065 = vmatprep.mubr.f32.mxu1 %v2490_v12  ;;  %v1194_v14 = vld [vmem:[%s3296_s2 + $0x50] sm:$0xff]  ;;  %v313_v43 = vand.u32 4294901760, %v312_v6 }
  0x20   :  { %2039 = vmatprep.mubr.f32.mxu0 %v263_v44  ;;  %v1196_v44 = vld [vmem:[%s3296_s2 + $0x60] sm:$0xff] }
  0x21   :  { %1242 = vperm.xlu0 %2182, %v1192_v58   ;;  %1257 = vperm.xlu1 %2183, %v1195_v59   ;;  %v1462_v58 = vld [vmem:[%s3298_s4] sm:$0xff]  ;;  %v1465_v59 = vld [vmem:[%s3298_s4 + $0x18] sm:$0xff] }
  0x22   :  { %2066 = vmatmul.mubr.f32.gmra.mxu1 %v2513_v38 }
  0x23   :  { %2040 = vmatmul.mubr.f32.gmra.mxu0 %v273_v50  ;;  %2068 = vmatprep.mubr.f32.mxu1 %v2515_v39  ;;  %v1198_v50 = vld [vmem:[%s3296_s2 + $0x70] sm:$0xff] }
  0x24   :  { %2042 = vmatprep.mubr.f32.mxu0 %v283_v63 }
  0x25   :  { %1252 = vperm.xlu0 %2182, %v1194_v14   ;;  %1267 = vperm.xlu1 %2183, %v1197_v15  }
  0x26   :  { %2069 = vmatmul.mubr.f32.gmra.mxu1 %v2517_v42 }
  0x27   :  { %2043 = vmatmul.mubr.f32.gmra.mxu0 %v293_v1  ;;  %2071 = vmatprep.mubr.f32.mxu1 %v2548_v56 }
  0x28   :  { %2045 = vmatprep.mubr.f32.mxu0 %v303_v23 }
  0x29   :  { %1262 = vperm.xlu0 %2182, %v1196_v44   ;;  %1277 = vperm.xlu1 %2183, %v1199_v45  }
  0x2a   :  { %2072 = vmatmul.mubr.f32.gmra.mxu1 %v2570_v7 }
  0x2b   :  { %2046 = vmatmul.mubr.f32.gmra.mxu0 %v313_v43  ;;  %2102 = vmatprep.mubr.f32.mxu1 %v161_v28  ;;  %v1469_v28 = vld [vmem:[%s3298_s4 + $0x38] sm:$0xff] }
  0x2c   :  { %2076 = vmatprep.mubr.f32.mxu0 %v2381_v20  ;;  %v1694_v20 = vmul.f32 0.5, %v1463_v54 }
  0x2d   :  { %1272 = vperm.xlu0 %2182, %v1198_v50   ;;  %1485 = vperm.xlu1 %2183, %v1463_v54  }
  0x2e   :  { %2103 = vmatmul.mubr.f32.vlgmr.msra.gmra.mxu1 %v171_v29  ;;  %2184 = vtanh.f32 %v1694_v20 }
  0x2f   :  { %2077 = vmatmul.mubr.f32.vlgmr.msra.gmra.mxu0 %v2385_v21  ;;  %2153 = vmatpush3.msra.mxu1 %v2345_v3  ;;  %v1464_v21 = vld [vmem:[%s3298_s4 + $0x10] sm:$0xff]  ;;  %v1467_v3 = vld [vmem:[%s3298_s4 + $0x28] sm:$0xff] }
  0x30   :  { %2127 = vmatpush3.msra.mxu0 %v2391_v24  ;;  %2079 = vmatprep.mubr.f32.mxu0 %v2395_v25  ;;  %v1693_v24 = vmul.f32 0.5, %v1462_v58  ;;  %v1696_v25 = vmul.f32 0.5, %v1465_v59  ;;  %v1695_v29 = vmul.f32 0.5, %v1464_v21 }
  0x31   :  { %2105 = vmatprep.mubr.f32.mxu1 %v181_v35  ;;  %1480 = vperm.xlu0 %2182, %v1462_v58   ;;  %v1468_v35 = vld [vmem:[%s3298_s4 + $0x30] sm:$0xff] }
  0x32   :  { %1495 = vperm.xlu1 %2183, %v1465_v59   ;;  %2106 = vmatmul.mubr.f32.gmra.mxu1 %v191_v36  ;;  %2186 = vtanh.f32 %v1693_v24  ;;  %v1471_v36 = vld [vmem:[%s3298_s4 + $0x48] sm:$0xff] }
  0x33   :  { %2080 = vmatmul.mubr.f32.gmra.mxu0 %v2398_v26  ;;  %2108 = vmatprep.mubr.f32.mxu1 %v201_v40  ;;  %v1466_v26 = vld [vmem:[%s3298_s4 + $0x20] sm:$0xff]  ;;  %2188 = vtanh.f32 %v1696_v25  ;;  %v1700_v40 = vmul.f32 0.5, %v1469_v28 }
  0x34   :  { %2082 = vmatprep.mubr.f32.mxu0 %v2405_v30  ;;  %v1698_v30 = vmul.f32 0.5, %v1467_v3  ;;  %2190 = vtanh.f32 %v1695_v29 }
  0x35   :  { %1490 = vperm.xlu0 %2182, %v1464_v21  }
  0x36   :  { %1505 = vperm.xlu1 %2183, %v1467_v3   ;;  %2109 = vmatmul.mubr.f32.gmra.mxu1 %v211_v47  ;;  %2192 = vtanh.f32 %v1698_v30  ;;  %v1470_v47 = vld [vmem:[%s3298_s4 + $0x40] sm:$0xff] }
  0x37   :  { %2083 = vmatmul.mubr.f32.gmra.mxu0 %v2419_v37  ;;  %2111 = vmatprep.mubr.f32.mxu1 %v221_v61  ;;  %v1697_v37 = vmul.f32 0.5, %v1466_v26  ;;  %v1699_v61 = vmul.f32 0.5, %v1468_v35 }
  0x38   :  { %2085 = vmatprep.mubr.f32.mxu0 %v2450_v52  ;;  %v1473_v52 = vld [vmem:[%s3298_s4 + $0x58] sm:$0xff] }
  0x39   :  { %1500 = vperm.xlu0 %2182, %v1466_v26   ;;  %2194 = vtanh.f32 %v1697_v37 }
  0x3a   :  { %1515 = vperm.xlu1 %2183, %v1469_v28   ;;  %2112 = vmatmul.mubr.f32.gmra.mxu1 %v231_v31  ;;  %2196 = vtanh.f32 %v1700_v40  ;;  %v1472_v31 = vld [vmem:[%s3298_s4 + $0x50] sm:$0xff] }
  0x3b   :  { %2086 = vmatmul.mubr.f32.gmra.mxu0 %v2486_v8  ;;  %2114 = vmatprep.mubr.f32.mxu1 %v241_v34  ;;  %v1702_v8 = vmul.f32 0.5, %v1471_v36  ;;  %2198 = vtanh.f32 %v1699_v61 }
  0x3c   :  { %2088 = vmatprep.mubr.f32.mxu0 %v2494_v13  ;;  %v2185_v13 = vpop.eup %2184 }
  0x3d   :  { %1510 = vperm.xlu0 %2182, %v1468_v35   ;;  %2200 = vtanh.f32 %v1702_v8 }
  0x3e   :  { %1525 = vperm.xlu1 %2183, %v1471_v36   ;;  %2115 = vmatmul.mubr.f32.gmra.mxu1 %v251_v46  ;;  %v1726_v46 = vmul.f32 0.5, %v2185_v13 }
  0x3f   :  { %2089 = vmatmul.mubr.f32.gmra.mxu0 %v2505_v32  ;;  %2117 = vmatprep.mubr.f32.mxu1 %v261_v48  ;;  %v1475_v32 = vld [vmem:[%s3298_s4 + $0x68] sm:$0xff]  ;;  %v2187_v34 = vpop.eup %2186  ;;  %v1704_v48 = vmul.f32 0.5, %v1473_v52 }
  0x40   :  { %2091 = vmatprep.mubr.f32.mxu0 %v2508_v33  ;;  %v1701_v33 = vmul.f32 0.5, %v1470_v47  ;;  %v1706_v63 = vmul.f32 0.5, %v1475_v32 }
  0x41   :  { %1520 = vperm.xlu0 %2182, %v1470_v47  }
  0x42   :  { %1535 = vperm.xlu1 %2183, %v1473_v52   ;;  %2118 = vmatmul.mubr.f32.gmra.mxu1 %v271_v60  ;;  %v1474_v60 = vld [vmem:[%s3298_s4 + $0x60] sm:$0xff]  ;;  %2202 = vtanh.f32 %v1701_v33 }
  0x43   :  { %2092 = vmatmul.mubr.f32.gmra.mxu0 %v2536_v51  ;;  %2120 = vmatprep.mubr.f32.mxu1 %v281_v2  ;;  %v2189_v51 = vpop.eup %2188  ;;  %v1703_v2 = vmul.f32 0.5, %v1472_v31  ;;  %2204 = vtanh.f32 %v1704_v48 }
  0x44   :  { %2094 = vmatprep.mubr.f32.mxu0 %v2539_v53  ;;  %v1477_v53 = vld [vmem:[%s3298_s4 + $0x78] sm:$0xff]  ;;  %v2191_v0 = vpop.eup %2190  ;;  %v1728_v1 = vmul.f32 0.5, %v2189_v51 }
  0x45   :  { %1530 = vperm.xlu0 %2182, %v1472_v31   ;;  %v2193_v6 = vpop.eup %2192  ;;  %2206 = vtanh.f32 %v1703_v2  ;;  %v1708_v14 = vmul.f32 0.5, %v1477_v53  ;;  %v1727_v44 = vmul.f32 0.5, %v2191_v0 }
  0x46   :  { %1545 = vperm.xlu1 %2183, %v1475_v32   ;;  %2121 = vmatmul.mubr.f32.gmra.mxu1 %v291_v18  ;;  %v1725_v18 = vmul.f32 0.5, %v2187_v34  ;;  %2208 = vtanh.f32 %v1706_v63  ;;  %v2195_v15 = vpop.eup %2194  ;;  %v1744_v43 = vadd.f32 0.5, %v1728_v1 }
  0x47   :  { %2095 = vmatmul.mubr.f32.gmra.mxu0 %v2546_v55  ;;  %2123 = vmatprep.mubr.f32.mxu1 %v301_v49  ;;  %v1742_v55 = vadd.f32 0.5, %v1726_v46  ;;  %v1705_v49 = vmul.f32 0.5, %v1474_v60  ;;  %v1743_v50 = vadd.f32 0.5, %v1727_v44  ;;  %v1729_v58 = vmul.f32 0.5, %v2195_v15 }
  0x48   :  { %2097 = vmatprep.mubr.f32.mxu0 %v2567_v5  ;;  %v1476_v5 = vld [vmem:[%s3298_s4 + $0x70] sm:$0xff]  ;;  %v1741_v23 = vadd.f32 0.5, %v1725_v18 }
  0x49   :  { %1540 = vperm.xlu0 %2182, %v1474_v60   ;;  %2210 = vtanh.f32 %v1705_v49 }
  0x4a   :  { %1555 = vperm.xlu1 %2183, %v1477_v53   ;;  %2124 = vmatmul.mubr.f32.gmra.mxu1 %v311_v57  ;;  %v2197_v57 = vpop.eup %2196  ;;  %2212 = vtanh.f32 %v1708_v14 }
  0x4b   :  { %2098 = vmatmul.mubr.f32.gmra.mxu0 %v2578_v19  ;;  %2154 = vmatprep.mubr.f32.mxu1 %v2358_v10  ;;  %v1730_v19 = vmul.f32 0.5, %v2193_v6  ;;  %v2199_v45 = vpop.eup %2198  ;;  %v1732_v59 = vmul.f32 0.5, %v2197_v57 }
  0x4c   :  { %2128 = vmatprep.mubr.f32.mxu0 %v2358_v10  ;;  %v1707_v10 = vmul.f32 0.5, %v1476_v5  ;;  %v2201_v20 = vpop.eup %2200  ;;  %v1731_v3 = vmul.f32 0.5, %v2199_v45 }
  0x4d   :  { %1550 = vperm.xlu0 %2182, %v1476_v5   ;;  %v1746_v54 = vadd.f32 0.5, %v1730_v19  ;;  %v1748_v21 = vadd.f32 0.5, %v1732_v59  ;;  %v1734_v24 = vmul.f32 0.5, %v2201_v20 }
  0x4e   :  { %1796 = vperm.xlu1 %2183, %v1742_v55   ;;  %2155 = vmatmul.mubr.f32.vlgmr.msra.gmra.mxu1 %v2360_v11  ;;  %2214 = vtanh.f32 %v1707_v10 }
  0x4f   :  { %2129 = vmatmul.mubr.f32.vlgmr.msra.gmra.mxu0 %v2360_v11  ;;  %2157 = vmatprep.mubr.f32.mxu1 %v2371_v16  ;;  %v2203_v11 = vpop.eup %2202  ;;  %v1750_v28 = vadd.f32 0.5, %v1734_v24 }
  0x50   :  { %2131 = vmatprep.mubr.f32.mxu0 %v2371_v16  ;;  %v1745_v16 = vadd.f32 0.5, %v1729_v58  ;;  %v2205_v25 = vpop.eup %2204  ;;  %v1733_v29 = vmul.f32 0.5, %v2203_v11 }
  0x51   :  { %1791 = vperm.xlu0 %2182, %v1741_v23   ;;  %v1736_v30 = vmul.f32 0.5, %v2205_v25 }
  0x52   :  { %1806 = vperm.xlu1 %2183, %v1744_v43   ;;  %2158 = vmatmul.mubr.f32.gmra.mxu1 %v2373_v17 }
  0x53   :  { %2132 = vmatmul.mubr.f32.gmra.mxu0 %v2373_v17  ;;  %2160 = vmatprep.mubr.f32.mxu1 %v2387_v22  ;;  %v2207_v17 = vpop.eup %2206  ;;  %v1752_v36 = vadd.f32 0.5, %v1736_v30 }
  0x54   :  { %2134 = vmatprep.mubr.f32.mxu0 %v2387_v22  ;;  %v2209_v26 = vpop.eup %2208  ;;  %v1747_v22 = vadd.f32 0.5, %v1731_v3  ;;  %v1735_v37 = vmul.f32 0.5, %v2207_v17 }
  0x55   :  { %1801 = vperm.xlu0 %2182, %v1743_v50   ;;  %v1738_v40 = vmul.f32 0.5, %v2209_v26 }
  0x56   :  { %1816 = vperm.xlu1 %2183, %v1746_v54   ;;  %2161 = vmatmul.mubr.f32.gmra.mxu1 %v2400_v27 }
  0x57   :  { %2135 = vmatmul.mubr.f32.gmra.mxu0 %v2400_v27  ;;  %2163 = vmatprep.mubr.f32.mxu1 %v2428_v41  ;;  %v2211_v27 = vpop.eup %2210  ;;  %v1754_v47 = vadd.f32 0.5, %v1738_v40 }
  0x58   :  { %2137 = vmatprep.mubr.f32.mxu0 %v2428_v41  ;;  %v2213_v35 = vpop.eup %2212  ;;  %v1749_v41 = vadd.f32 0.5, %v1733_v29  ;;  %v1737_v52 = vmul.f32 0.5, %v2211_v27 }
  0x59   :  { %1811 = vperm.xlu0 %2182, %v1745_v16   ;;  %v1740_v61 = vmul.f32 0.5, %v2213_v35 }
  0x5a   :  { %1826 = vperm.xlu1 %2183, %v1748_v21   ;;  %2164 = vmatmul.mubr.f32.gmra.mxu1 %v2466_v62 }
  0x5b   :  { %2138 = vmatmul.mubr.f32.gmra.mxu0 %v2466_v62  ;;  %2166 = vmatprep.mubr.f32.mxu1 %v2476_v4  ;;  %v2215_v62 = vpop.eup %2214  ;;  %v1756_v8 = vadd.f32 0.5, %v1740_v61 }
  0x5c   :  { %2140 = vmatprep.mubr.f32.mxu0 %v2476_v4  ;;  %v1751_v4 = vadd.f32 0.5, %v1735_v37 }
  0x5d   :  { %1821 = vperm.xlu0 %2182, %v1747_v22  }
  0x5e   :  { %1836 = vperm.xlu1 %2183, %v1750_v28   ;;  %2167 = vmatmul.mubr.f32.gmra.mxu1 %v2488_v9 }
  0x5f   :  { %2141 = vmatmul.mubr.f32.gmra.mxu0 %v2488_v9  ;;  %2169 = vmatprep.mubr.f32.mxu1 %v2490_v12  ;;  %v1753_v9 = vadd.f32 0.5, %v1737_v52 }
  0x60   :  { %2143 = vmatprep.mubr.f32.mxu0 %v2490_v12  ;;  %v1739_v12 = vmul.f32 0.5, %v2215_v62 }
  0x61   :  { %1831 = vperm.xlu0 %2182, %v1749_v41  }
  0x62   :  { %1846 = vperm.xlu1 %2183, %v1752_v36   ;;  %2170 = vmatmul.mubr.f32.gmra.mxu1 %v2513_v38 }
  0x63   :  { %2144 = vmatmul.mubr.f32.gmra.mxu0 %v2513_v38  ;;  %2172 = vmatprep.mubr.f32.mxu1 %v2515_v39  ;;  %v1755_v38 = vadd.f32 0.5, %v1739_v12 }
  0x64   :  { %2146 = vmatprep.mubr.f32.mxu0 %v2515_v39 }
  0x65   :  { %1841 = vperm.xlu0 %2182, %v1751_v4  }
  0x66   :  { %1856 = vperm.xlu1 %2183, %v1754_v47   ;;  %2173 = vmatmul.mubr.f32.gmra.mxu1 %v2517_v42 }
  0x67   :  { %2147 = vmatmul.mubr.f32.gmra.mxu0 %v2517_v42  ;;  %2175 = vmatprep.mubr.f32.mxu1 %v2548_v56 }
  0x68   :  { %2149 = vmatprep.mubr.f32.mxu0 %v2548_v56 }
  0x69   :  { %1851 = vperm.xlu0 %2182, %v1753_v9  }
  0x6a   :  { %1866 = vperm.xlu1 %2183, %v1756_v8   ;;  %2176 = vmatmul.mubr.f32.gmra.mxu1 %v2570_v7 }
  0x6b   :  { %2150 = vmatmul.mubr.f32.gmra.mxu0 %v2570_v7 }
  0x6d   :  { %1861 = vperm.xlu0 %2182, %v1755_v38  }
  0x80   :  { %v2791_v0 = vpop.permute.xlu1 %1212 }
  0x82   :  { %v2797_v5 = vpop.permute.xlu0 %1202 }
  0x84   :  { %v2801_v23 = vpop.permute.xlu1 %1217 }
  0x90   :  { %v1208_v50 = vpop.permute.xlu0 %1207  ;;  %v1228_v20 = vpop.permute.xlu1 %1227 }
  0x94   :  { %v1223_v17 = vpop.permute.xlu0 %1222  ;;  %v1238_v29 = vpop.permute.xlu1 %1237 }
  0x98   :  { %v1233_v36 = vpop.permute.xlu0 %1232  ;;  %v1248_v62 = vpop.permute.xlu1 %1247 }
  0x9c   :  { %v1243_v9 = vpop.permute.xlu0 %1242  ;;  %v1258_v38 = vpop.permute.xlu1 %1257 }
  0xce   :  { %v2761_v13 = vpop.f32.mrf.mxu1 }
  0xcf   :  { %v2759_v39 = vpop.f32.mrf.mxu0 }
  0xd0   :  { %v2765_v32 = vpop.f32.mrf.mxu1 }
  0xd1   :  { %v2763_v31 = vpop.f32.mrf.mxu0 }
  0xd2   :  { %v2769_v33 = vpop.f32.mrf.mxu1 }
  0xd3   :  { %v2767_v42 = vpop.f32.mrf.mxu0 }
  0xd4   :  { %v2773_v34 = vpop.f32.mrf.mxu1 }
  0xd5   :  { %v2771_v56 = vpop.f32.mrf.mxu0 }
  0xd6   :  { %v2777_v7 = vpop.f32.mrf.mxu1 }
  0xd7   :  { %v2775_v46 = vpop.f32.mrf.mxu0 }
  0xd8   :  { %v2781_v51 = vpop.f32.mrf.mxu1 }
  0xd9   :  { %v2779_v48 = vpop.f32.mrf.mxu0 }
  0xda   :  { %v2785_v53 = vpop.f32.mrf.mxu1 }
  0xdb   :  { %v2783_v60 = vpop.f32.mrf.mxu0 }
  0xdc   :  { %v2789_v63 = vpop.f32.mrf.mxu1 }
  0xdd   :  { %v2787_v2 = vpop.f32.mrf.mxu0 }
  0xde   :  { %v2795_v18 = vpop.f32.mrf.mxu1 }
  0xdf   :  { %v2793_v55 = vpop.f32.mrf.mxu0 }
  0xe0   :  { %v439_v6 = vpop.f32.mrf.mxu1 }
  0xe1   :  { %v245_v1 = vpop.f32.mrf.mxu0 }
  0xe2   :  { %v2799_v49 = vadd.f32 %v439_v6, %v245_v1  ;;  %v2067_v15 = vpop.f32.mrf.mxu1 }
  0xe3   :  { %v2041_v14 = vpop.f32.mrf.mxu0 }
  0xe4   :  { %v2803_v43 = vadd.f32 %v2067_v15, %v2041_v14  ;;  %v451_v19 = vpop.f32.mrf.mxu1 }
  0xe5   :  { %v265_v44 = vpop.f32.mrf.mxu0 }
  0xe6   :  { %v2805_v57 = vadd.f32 %v451_v19, %v265_v44  ;;  %v2070_v45 = vpop.f32.mrf.mxu1  ;;  %v1253_v44 = vpop.permute.xlu0 %1252 }
  0xe7   :  { %v2044_v10 = vpop.f32.mrf.mxu0 }
  0xe8   :  { %3300 = vst [vmem:[#allocation5_spill] sm:$0xff] %v2805_v57  ;;  %v2807_v54 = vadd.f32 %v2070_v45, %v2044_v10  ;;  %v463_v59 = vpop.f32.mrf.mxu1  ;;  %v1268_v45 = vpop.permute.xlu1 %1267 }
  0xe9   :  { %v285_v58 = vpop.f32.mrf.mxu0 }
  0xea   :  { %3301 = vst [vmem:[#allocation6_spill] sm:$0xff] %v2807_v54  ;;  %v2809_v11 = vadd.f32 %v463_v59, %v285_v58  ;;  %v2073_v21 = vpop.f32.mrf.mxu1 }
  0xeb   :  { %v2047_v16 = vpop.f32.mrf.mxu0 }
  0xec   :  { %3302 = vst [vmem:[#allocation7_spill] sm:$0xff] %v2809_v11  ;;  %v2811_v3 = vadd.f32 %v2073_v21, %v2047_v16  ;;  %v475_v25 = vpop.f32.mrf.mxu1  ;;  %v1278_v11 = vpop.permute.xlu1 %1277 }
  0xed   :  { %v305_v24 = vpop.f32.mrf.mxu0 }
  0xee   :  { %3303 = vst [vmem:[#allocation8_spill] sm:$0xff] %v2811_v3  ;;  %v2813_v26 = vadd.f32 %v475_v25, %v305_v24  ;;  %v2104_v28 = vpop.f32.mrf.mxu1  ;;  %v1263_v24 = vpop.permute.xlu0 %1262  ;;  %v1919_v25 = vld [vmem:[%s3297_s3] ss:$0 sm:$0xff]  ;;  %s2303_s3 = smov [#allocation2]  }
  0xef   :  { %v2078_v22 = vpop.f32.mrf.mxu0  ;;  %s1906_s9 = sshll.u32 %s2303_s3, 4  ;;  %s1907_s9 = int_to_ptr.vmem [resolvable:$true] %s1906_s9 }
  0xf0   :  { %3304 = vst [vmem:[#allocation9_spill] sm:$0xff] %v2813_v26  ;;  %v2815_v27 = vpop.f32.mrf.mxu1  ;;  %s2280_s0 = scalar_lea.vmem %s1907_s9, 2048  ;;  %p2285_p1 = scmp.lt.s32.totalorder %s1907_s9, %s1907_s9 }
  0xf1   :  { %v555_v30 = vpop.f32.mrf.mxu0  ;;  %p2281_p0 = scmp.ne.s32.totalorder %s1907_s9, %s2280_s0  ;;  %p2286_p2 = scmp.lt.s32.totalorder %s2280_s0, %s2280_s0 }
  0xf2   :  { %v2817_v41 = vpop.f32.mrf.mxu1 }
  0xf3   :  { %v2081_v35 = vpop.f32.mrf.mxu0  ;;  %p2287_p3 = por %p2286_p2, %p2285_p1 }
  0xf4   :  { %v2821_v40 = vpop.f32.mrf.mxu1 }
  0xf5   :  { %v2819_v37 = vpop.f32.mrf.mxu0  ;;  %p2288_p4 = pnand %p2287_p3, %p2281_p0 }
  0xf6   :  { %v2825_v47 = vpop.f32.mrf.mxu1 }
  0xf7   :  { %v2823_v4 = vpop.f32.mrf.mxu0 }
  0xf8   :  { %v2829_v61 = vpop.f32.mrf.mxu1 }
  0xf9   :  { %v2827_v52 = vpop.f32.mrf.mxu0 }
  0xfa   :  { %v2833_v12 = vpop.f32.mrf.mxu1 }
  0xfb   :  { %v2831_v8 = vpop.f32.mrf.mxu0 }
  0xfc   :  { %v2837_v6 = vpop.f32.mrf.mxu1 }
  0xfd   :  { %v2835_v1 = vpop.f32.mrf.mxu0 }
  0xfe   :  { %v2841_v15 = vpop.f32.mrf.mxu1 }
  0xff   :  { %v2839_v14 = vpop.f32.mrf.mxu0  ;;  %3305 = vst [vmem:[#allocation10_spill] sm:$0xff] %v2841_v15  ;;  %v1658_v15 = vlaneseq }
 0x100   :  { %v2845_v10 = vpop.f32.mrf.mxu1 }
 0x101   :  { %v2843_v19 = vpop.f32.mrf.mxu0  ;;  %3306 = vst [vmem:[#allocation11_spill] sm:$0xff] %v2845_v10  ;;  %v398_v10 = vadd.f32 %v2761_v13, %v2759_v39  ;;  %v2881_v39 = vadd.f32 %v1919_v25, %v1228_v20 }
 0x102   :  { %v2849_v59 = vpop.f32.mrf.mxu1 }
 0x103   :  { %v2847_v58 = vpop.f32.mrf.mxu0  ;;  %3308 = vst [vmem:[#allocation13_spill] sm:$0xff] %v2849_v59  ;;  %v563_v57 = vadd.f32 %v2078_v22, %v398_v10  ;;  %v2893_v22 = vadd.f32 %v1919_v25, %v1233_v36  ;;  %v2911_v36 = vadd.f32 %v1919_v25, %v1253_v44 }
 0x104   :  { %3307 = vst [vmem:[#allocation12_spill] sm:$0xff] %v2847_v58  ;;  %v2853_v21 = vpop.f32.mrf.mxu1  ;;  %v2879_v58 = vadd.f32 %v1919_v25, %v1208_v50  ;;  %v2897_v50 = vadd.f32 %v1919_v25, %v1243_v9  ;;  %v2915_v9 = vadd.f32 %v1919_v25, %v1263_v24 }
 0x105   :  { %v2851_v16 = vpop.f32.mrf.mxu0  ;;  %3310 = vst [vmem:[#allocation15_spill] sm:$0xff] %v2853_v21  ;;  %v2869_v21 = vadd.f32 %v1919_v25, %v2791_v0  ;;  %v2887_v0 = vadd.f32 %v1919_v25, %v1223_v17  ;;  %3316 = vst [vmem:[#allocation21_spill] sm:$0xff] %v2893_v22  ;;  %v2905_v17 = vadd.f32 %v1919_v25, %v1258_v38 }
 0x106   :  { %3309 = vst [vmem:[#allocation14_spill] sm:$0xff] %v2851_v16  ;;  %v2860_v3 = vpop.f32.mrf.mxu1  ;;  %v392_v16 = vadd.f32 %v2765_v32, %v2763_v31  ;;  %v1273_v31 = vpop.permute.xlu0 %1272  ;;  %v410_v32 = vadd.f32 %v2769_v33, %v2767_v42  ;;  %3318 = vst [vmem:[#allocation23_spill] sm:$0xff] %v2897_v50  ;;  %v404_v42 = vadd.f32 %v2773_v34, %v2771_v56 }
 0x107   :  { %v2858_v26 = vpop.f32.mrf.mxu0  ;;  %3312 = vst [vmem:[#allocation17_spill] sm:$0xff] %v2860_v3  ;;  %3314 = vst [vmem:[#allocation19_spill] sm:$0xff] %v2869_v21  ;;  %v2877_v3 = vadd.f32 %v1919_v25, %v2801_v23  ;;  %v2889_v21 = vadd.f32 %v1919_v25, %v1238_v29  ;;  %v2895_v23 = vadd.f32 %v1919_v25, %v1248_v62  ;;  %v2907_v29 = vpop.permute.xlu1 %1485 }
 0x108   :  { %3311 = vst [vmem:[#allocation16_spill] sm:$0xff] %v2858_v26  ;;  %v2866_v59 = vpop.f32.mrf.mxu1  ;;  %v2874_v26 = vadd.f32 %v1919_v25, %v2797_v5  ;;  %v556_v5 = vadd.f32 %v555_v30, %v392_v16  ;;  %3319 = vst [vmem:[#allocation24_spill] sm:$0xff] %v2905_v17  ;;  %v743_v33 = vadd.f32 %v2104_v28, %v563_v57  ;;  %v2928_v57 = vand.u32 127, %v1658_v15 }
 0x109   :  { %v2864_v54 = vpop.f32.mrf.mxu0  ;;  %3313 = vst [vmem:[#allocation18_spill] sm:$0xff] %v2866_v59  ;;  %3317 = vst [vmem:[#allocation22_spill] sm:$0xff] %v2895_v23  ;;  %v577_v30 = vadd.f32 %v2081_v35, %v410_v32  ;;  %v2913_v62 = vadd.f32 %v1919_v25, %v1268_v45  ;;  %v2917_v16 = vadd.f32 %v1919_v25, %v1278_v11 }
 0x10a   :  { %v2885_v59 = vpop.f32.mrf.mxu1  ;;  %3320 = vst [vmem:[#allocation25_spill] sm:$0xff] %v2907_v29  ;;  %v2919_v22 = vadd.f32 %v1919_v25, %v1273_v31  ;;  %v735_v38 = vadd.f32 %v2815_v27, %v556_v5  ;;  %v570_v17 = vadd.f32 %v2819_v37, %v404_v42  ;;  %v422_v56 = vadd.f32 %v2777_v7, %v2775_v46  ;;  %v2933_v44 = vpop.permute.xlu0 %1480 }
 0x10b   :  { %v2883_v13 = vpop.f32.mrf.mxu0  ;;  %3315 = vst [vmem:[#allocation20_spill] sm:$0xff] %v2885_v59  ;;  %v2903_v59 = vshrl.u32 %v1658_v15, 7  ;;  %v759_v27 = vadd.f32 %v2817_v41, %v577_v30  ;;  %v416_v46 = vadd.f32 %v2781_v51, %v2779_v48  ;;  %v434_v7 = vadd.f32 %v2785_v53, %v2783_v60  ;;  %v2946_v5 = vpop.permute.xlu1 %1495 }
 0x10c   :  { %v2901_v10 = vpop.f32.mrf.mxu1  ;;  %v428_v15 = vadd.f32 %v2789_v63, %v2787_v2  ;;  %v591_v25 = vadd.f32 %v2823_v4, %v422_v56  ;;  %v751_v41 = vadd.f32 %v2821_v40, %v570_v17  ;;  %v446_v40 = vadd.f32 %v2795_v18, %v2793_v55 }
 0x10d   :  { %v2899_v20 = vpop.f32.mrf.mxu0  ;;  %v2926_v34 = vadd.s32 8, %v2903_v59  ;;  %v2931_v35 = vadd.s32 24, %v2903_v59  ;;  %v2937_v24 = vadd.s32 16, %v2903_v59  ;;  %v584_v42 = vadd.f32 %v2827_v52, %v416_v46 }
 0x10e   :  { %v2156_v23 = vpop.f32.mrf.mxu1  ;;  %v605_v48 = vadd.f32 %v2831_v8, %v434_v7  ;;  %v598_v51 = vadd.f32 %v2835_v1, %v428_v15  ;;  %v2953_v2 = vadd.s32 40, %v2903_v59  ;;  %v775_v17 = vadd.f32 %v2825_v47, %v591_v25  ;;  %v2965_v56 = vpop.permute.xlu0 %1490 }
 0x10f   :  { %v2130_v50 = vpop.f32.mrf.mxu0  ;;  %v2960_v8 = vadd.s32 32, %v2903_v59  ;;  %v2963_v1 = vadd.s32 56, %v2903_v59  ;;  %v767_v55 = vadd.f32 %v2829_v61, %v584_v42  ;;  %v619_v18 = vadd.f32 %v2839_v14, %v446_v40  ;;  %v2975_v7 = vpop.permute.xlu1 %1505  ;;  %v3322_v42 = vld [vmem:[#allocation5_spill] sm:$0xff] }
 0x110   :  { %v935_v29 = vadd.f32 %v2130_v50, %v743_v33  ;;  %v1090_v11 = vpop.f32.mrf.mxu1  ;;  %v2973_v46 = vadd.s32 48, %v2903_v59  ;;  %v791_v15 = vadd.f32 %v2833_v12, %v605_v48  ;;  %v783_v25 = vadd.f32 %v2837_v6, %v598_v51  ;;  %v3323_v12 = vld [vmem:[#allocation14_spill] sm:$0xff] }
 0x111   :  { %v928_v28 = vpop.f32.mrf.mxu0  ;;  %v626_v48 = vadd.f32 %v3323_v12, %v3322_v42  ;;  %v3332_v42 = vld [vmem:[#allocation13_spill] sm:$0xff] }
 0x112   :  { %v1097_v45 = vadd.f32 %v2156_v23, %v935_v29  ;;  %v929_v37 = vadd.f32 %v928_v28, %v735_v38  ;;  %v2159_v32 = vpop.f32.mrf.mxu1  ;;  %v2995_v40 = vpop.permute.xlu0 %1500 }
 0x113   :  { %v2133_v31 = vpop.f32.mrf.mxu0 }
 0x114   :  { %v1303_v23 = vmul.f32 2.0, %v1097_v45  ;;  %v1091_v50 = vadd.f32 %v1090_v11, %v929_v37  ;;  %v947_v29 = vadd.f32 %v2133_v31, %v759_v27  ;;  %v1102_v53 = vpop.f32.mrf.mxu1 }
 0x115   :  { %v940_v60 = vpop.f32.mrf.mxu0 }
 0x116   :  { %v1319_v63 = vsub.f32 %v2879_v58, %v1303_v23  ;;  %v1302_v4 = vmul.f32 2.0, %v1091_v50  ;;  %v1109_v33 = vadd.f32 %v2159_v32, %v947_v29  ;;  %v941_v30 = vadd.f32 %v940_v60, %v751_v41  ;;  %v2162_v38 = vpop.f32.mrf.mxu1  ;;  %v3321_v50 = vld [vmem:[#allocation12_spill] sm:$0xff]  ;;  %v3324_v60 = vld [vmem:[#allocation10_spill] sm:$0xff] }
 0x117   :  { %v2136_v52 = vpop.f32.mrf.mxu0  ;;  %v633_v29 = vadd.f32 %v3321_v50, %v2803_v43 }
 0x118   :  { %v2967_v28 = vmax.f32 %v1319_v63, 0.0  ;;  %v1318_v58 = vsub.f32 %v2874_v26, %v1302_v4  ;;  %v1305_v11 = vmul.f32 2.0, %v1109_v33  ;;  %v1103_v27 = vadd.f32 %v1102_v53, %v941_v30  ;;  %v1114_v37 = vpop.f32.mrf.mxu1  ;;  %v3326_v53 = vld [vmem:[#allocation16_spill] sm:$0xff]  ;;  %v3327_v4 = vld [vmem:[#allocation7_spill] sm:$0xff] }
 0x119   :  { %v959_v47 = vadd.f32 %v2136_v52, %v775_v17  ;;  %v952_v45 = vpop.f32.mrf.mxu0  ;;  %v612_v26 = vadd.f32 %v2843_v19, %v2799_v49  ;;  %v807_v49 = vadd.f32 %v3324_v60, %v619_v18  ;;  %v3325_v19 = vld [vmem:[#allocation6_spill] sm:$0xff]  ;;  %v3328_v17 = vld [vmem:[#allocation19_spill] sm:$0xff]  ;;  %v823_v12 = vadd.f32 %v3332_v42, %v633_v29 }
 0x11a   :  { %2216 = vrsqrt.f32 %v2967_v28  ;;  %v2982_v61 = vmax.f32 %v1318_v58, 0.0  ;;  %v1321_v14 = vsub.f32 %v2877_v3, %v1305_v11  ;;  %v1304_v31 = vmul.f32 2.0, %v1103_v27  ;;  %v2165_v23 = vpop.f32.mrf.mxu1  ;;  %v3329_v11 = vld [vmem:[#allocation8_spill] sm:$0xff]  ;;  %v3335_v29 = vld [vmem:[#allocation18_spill] sm:$0xff] }
 0x11b   :  { %v1121_v32 = vadd.f32 %v2162_v38, %v959_v47  ;;  %v2139_v41 = vpop.f32.mrf.mxu0  ;;  %v953_v6 = vadd.f32 %v952_v45, %v767_v55  ;;  %v647_v63 = vadd.f32 %v3326_v53, %v3325_v19  ;;  %v640_v3 = vadd.f32 %v2864_v54, %v3327_v4  ;;  %v3330_v55 = vld [vmem:[#allocation9_spill] sm:$0xff] }
 0x11c   :  { %v971_v51 = vadd.f32 %v2139_v41, %v791_v15  ;;  %2218 = vrsqrt.f32 %v2982_v61  ;;  %v1126_v30 = vpop.f32.mrf.mxu1  ;;  %v2997_v43 = vmax.f32 %v1321_v14, 0.0  ;;  %v1320_v52 = vsub.f32 %v3328_v17, %v1304_v31  ;;  %v3331_v41 = vld [vmem:[#allocation11_spill] sm:$0xff]  ;;  %v3008_v31 = vpop.permute.xlu1 %1515 }
 0x11d   :  { %v964_v33 = vpop.f32.mrf.mxu0  ;;  %v1307_v38 = vmul.f32 2.0, %v1121_v32  ;;  %v1115_v58 = vadd.f32 %v1114_v37, %v953_v6  ;;  %v661_v27 = vadd.f32 %v2883_v13, %v3329_v11  ;;  %v654_v18 = vadd.f32 %v2899_v20, %v3330_v55  ;;  %v3333_v14 = vld [vmem:[#allocation15_spill] sm:$0xff] }
 0x11e   :  { %v1133_v47 = vadd.f32 %v2165_v23, %v971_v51  ;;  %v965_v54 = vadd.f32 %v964_v33, %v783_v25  ;;  %v2168_v15 = vpop.f32.mrf.mxu1  ;;  %v799_v50 = vadd.f32 %v3331_v41, %v612_v26  ;;  %v815_v60 = vadd.f32 %v3333_v14, %v626_v48  ;;  %v3334_v25 = vld [vmem:[#allocation17_spill] sm:$0xff]  ;;  %v3336_v48 = vld [vmem:[#allocation20_spill] sm:$0xff] }
 0x11f   :  { %v2142_v45 = vpop.f32.mrf.mxu0  ;;  %2220 = vrsqrt.f32 %v2997_v43  ;;  %v3010_v37 = vmax.f32 %v1320_v52, 0.0  ;;  %v1323_v13 = vsub.f32 %v2881_v39, %v1307_v38  ;;  %v1306_v32 = vmul.f32 2.0, %v1115_v58  ;;  %v3026_v52 = vpop.permute.xlu0 %1510 }
 0x120   :  { %v1309_v20 = vmul.f32 2.0, %v1133_v47  ;;  %v3014_v6 = vadd.f32 %v3334_v25, %v647_v63  ;;  %v1127_v51 = vadd.f32 %v1126_v30, %v965_v54  ;;  %v983_v26 = vadd.f32 %v2142_v45, %v807_v49  ;;  %v1138_v39 = vpop.f32.mrf.mxu1  ;;  %v3037_v55 = vpop.permute.xlu1 %1525 }
 0x121   :  { %v976_v23 = vpop.f32.mrf.mxu0  ;;  %v3017_v53 = vadd.f32 %v3335_v29, %v640_v3  ;;  %v3020_v4 = vadd.f32 %v3336_v48, %v661_v27  ;;  %v3023_v33 = vadd.f32 %v2901_v10, %v654_v18  ;;  %2222 = vrsqrt.f32 %v3010_v37  ;;  %v3337_v18 = vld [vmem:[#allocation21_spill] sm:$0xff]  ;;  %v3339_v48 = vld [vmem:[#allocation22_spill] sm:$0xff] }
 0x122   :  { %v977_v19 = vadd.f32 %v976_v23, %v799_v50  ;;  %v3028_v63 = vmax.f32 %v1323_v13, 0.0  ;;  %v1322_v49 = vsub.f32 %v2887_v0, %v1306_v32  ;;  %v1325_v30 = vsub.f32 %v2889_v21, %v1309_v20  ;;  %v2171_v54 = vpop.f32.mrf.mxu1 }
 0x123   :  { %v2145_v17 = vpop.f32.mrf.mxu0  ;;  %v1308_v3 = vmul.f32 2.0, %v1127_v51  ;;  %vm1359_vm1 = vcmp.eq.f32.partialorder %v2967_v28, inf  ;;  %v1145_v38 = vadd.f32 %v2168_v15, %v983_v26  ;;  %vm1361_vm2 = vcmp.eq.f32.partialorder %v2967_v28, 0.0  ;;  %v3050_v13 = vpop.permute.xlu0 %1520 }
 0x124   :  { %v1139_v58 = vadd.f32 %v1138_v39, %v977_v19  ;;  %v995_v11 = vadd.f32 %v2145_v17, %v823_v12  ;;  %v1362_v10 = vand.u32 2147483648, %v2967_v28  ;;  %vm1352_vm3 = vcmp.eq.f32.partialorder %v2982_v61, inf  ;;  %v3338_v19 = vld [vmem:[#allocation25_spill] sm:$0xff]  ;;  %v3340_v17 = vld [vmem:[#allocation23_spill] sm:$0xff] }
 0x125   :  { %2224 = vrsqrt.f32 %v3028_v63  ;;  %vm1354_vm4 = vcmp.eq.f32.partialorder %v2982_v61, 0.0  ;;  %v3040_v21 = vmax.f32 %v1322_v49, 0.0  ;;  %v3042_v0 = vmax.f32 %v1325_v30, 0.0  ;;  %v988_v42 = vpop.f32.mrf.mxu0 }
 0x126   :  { %v1324_v47 = vsub.f32 %v3337_v18, %v1308_v3  ;;  %v1311_v15 = vmul.f32 2.0, %v1145_v38  ;;  %v1310_v41 = vmul.f32 2.0, %v1139_v58  ;;  %v1157_v50 = vadd.f32 %v2171_v54, %v995_v11  ;;  %v3067_v38 = vpop.permute.xlu1 %1535 }
 0x127   :  { %v2217_v27 = vpop.eup %2216  ;;  %v1355_v12 = vand.u32 2147483648, %v2982_v61  ;;  %vm1373_vm5 = vcmp.eq.f32.partialorder %v2997_v43, inf  ;;  %vm1375_vm6 = vcmp.eq.f32.partialorder %v2997_v43, 0.0  ;;  %2226 = vrsqrt.f32 %v3040_v21 }
 0x128   :  { %v1358_v45 = vmul.f32 %v2217_v27, %v2967_v28  ;;  %v1376_v20 = vand.u32 2147483648, %v2997_v43  ;;  %vm1366_vm7 = vcmp.eq.f32.partialorder %v3010_v37, inf  ;;  %2228 = vrsqrt.f32 %v3042_v0 }
 0x129   :  { %v2219_v14 = vpop.eup %2218  ;;  %vm1368_vm8 = vcmp.eq.f32.partialorder %v3010_v37, 0.0  ;;  %v3062_v51 = vmax.f32 %v1324_v47, 0.0  ;;  %v989_v26 = vadd.f32 %v988_v42, %v815_v60  ;;  %v1327_v39 = vsub.f32 %v3339_v48, %v1311_v15  ;;  %v2148_v15 = vpop.f32.mrf.mxu0  ;;  %v3341_v42 = vld [vmem:[#allocation24_spill] sm:$0xff] }
 0x12a   :  { %v1360_v32 = vsel %vm1359_vm1, %v2967_v28, %v1358_v45  ;;  %v1351_v25 = vmul.f32 %v2219_v14, %v2982_v61  ;;  %v1326_v49 = vsub.f32 %v3340_v17, %v1310_v41  ;;  %v1313_v30 = vmul.f32 2.0, %v1157_v50  ;;  %v1150_v45 = vpop.f32.mrf.mxu1  ;;  %v3085_v50 = vpop.permute.xlu0 %1530 }
 0x12b   :  { %v1363_v23 = vsel %vm1361_vm2, %v1362_v10, %v1360_v32  ;;  %v1369_v58 = vand.u32 2147483648, %v3010_v37  ;;  %vm1387_vm9 = vcmp.eq.f32.partialorder %v3028_v63, inf  ;;  %2230 = vrsqrt.f32 %v3062_v51 }
 0x12c   :  { %v1559_v29 = vsub.f32 %v3338_v19, %v1363_v23  ;;  %v2221_v3 = vpop.eup %2220  ;;  %v1353_v28 = vsel %vm1352_vm3, %v2982_v61, %v1351_v25  ;;  %vm1389_vm10 = vcmp.eq.f32.partialorder %v3028_v63, 0.0  ;;  %v1390_v18 = vand.u32 2147483648, %v3028_v63 }
 0x12d   :  { %v1356_v11 = vsel %vm1354_vm4, %v1355_v12, %v1353_v28  ;;  %v1372_v10 = vmul.f32 %v2221_v3, %v2997_v43  ;;  %v3081_v47 = vmax.f32 %v1327_v39, 0.0  ;;  %v3083_v54 = vmax.f32 %v1326_v49, 0.0  ;;  %v2174_v3 = vpop.f32.mrf.mxu1  ;;  %v1000_v28 = vpop.f32.mrf.mxu0 }
 0x12e   :  { %v1575_v60 = vmul.f32 0.5, %v1559_v29  ;;  %v1558_v27 = vsub.f32 %v2933_v44, %v1356_v11  ;;  %v2223_v41 = vpop.eup %2222  ;;  %vm1380_vm11 = vcmp.eq.f32.partialorder %v3040_v21, inf  ;;  %v1329_v44 = vsub.f32 %v3341_v42, %v1313_v30  ;;  %v3117_v11 = vpop.permute.xlu0 %1540 }
 0x12f   :  { %v1374_v61 = vsel %vm1373_vm5, %v2997_v43, %v1372_v10  ;;  %v1151_v12 = vadd.f32 %v1150_v45, %v989_v26  ;;  %v1365_v23 = vmul.f32 %v2223_v41, %v3010_v37  ;;  %vm1382_vm12 = vcmp.eq.f32.partialorder %v3040_v21, 0.0  ;;  %v3101_v26 = vpop.permute.xlu1 %1545 }
 0x130   :  { %2232 = vtanh.f32 %v1575_v60  ;;  %v1574_v14 = vmul.f32 0.5, %v1558_v27  ;;  %v1377_v32 = vsel %vm1375_vm6, %v1376_v20, %v1374_v61  ;;  %v1383_v19 = vand.u32 2147483648, %v3040_v21 }
 0x131   :  { %2234 = vrsqrt.f32 %v3081_v47  ;;  %v1561_v25 = vsub.f32 %v2946_v5, %v1377_v32  ;;  %vm1401_vm13 = vcmp.eq.f32.partialorder %v3042_v0, inf  ;;  %v1007_v29 = vadd.f32 %v2148_v15, %v3014_v6 }
 0x132   :  { %v2225_v48 = vpop.eup %2224  ;;  %2236 = vtanh.f32 %v1574_v14  ;;  %v1367_v43 = vsel %vm1366_vm7, %v3010_v37, %v1365_v23  ;;  %vm1403_vm14 = vcmp.eq.f32.partialorder %v3042_v0, 0.0  ;;  %v1404_v20 = vand.u32 2147483648, %v3042_v0 }
 0x133   :  { %v1577_v39 = vmul.f32 0.5, %v1561_v25  ;;  %v1370_v5 = vsel %vm1368_vm8, %v1369_v58, %v1367_v43  ;;  %v1386_v17 = vmul.f32 %v2225_v48, %v3028_v63  ;;  %vm1394_vm15 = vcmp.eq.f32.partialorder %v3062_v51, inf  ;;  %v1162_v43 = vpop.f32.mrf.mxu1 }
 0x134   :  { %2238 = vrsqrt.f32 %v3083_v54  ;;  %v1560_v6 = vsub.f32 %v2965_v56, %v1370_v5  ;;  %vm1396_vm0 = vcmp.eq.f32.partialorder %v3062_v51, 0.0  ;;  %v3115_v49 = vmax.f32 %v1329_v44, 0.0  ;;  %v2227_v60 = vpop.eup %2226  ;;  %v3133_v44 = vpop.permute.xlu1 %1555 }
 0x135   :  { %v1312_v30 = vmul.f32 2.0, %v1151_v12  ;;  %2240 = vtanh.f32 %v1577_v39  ;;  %v1388_v37 = vsel %vm1387_vm9, %v3028_v63, %v1386_v17  ;;  %v1397_v58 = vand.u32 2147483648, %v3062_v51  ;;  %v2229_v27 = vpop.eup %2228  ;;  %v3154_v39 = vpop.permute.xlu0 %1550 }
 0x136   :  { %v1169_v10 = vadd.f32 %v2174_v3, %v1007_v29  ;;  %vm1758_vm1 = vcmp.eq.s32.totalorder %v2926_v34, %v2928_v57  ;;  %v1576_v56 = vmul.f32 0.5, %v1560_v6  ;;  %v1391_v45 = vsel %vm1389_vm10, %v1390_v18, %v1388_v37 }
 0x137   :  { %v1379_v15 = vmul.f32 %v2227_v60, %v3040_v21  ;;  %2242 = vrsqrt.f32 %v3115_v49  ;;  %v1563_v41 = vsub.f32 %v2975_v7, %v1391_v45  ;;  %v1400_v61 = vmul.f32 %v2229_v27, %v3042_v0 }
 0x138   :  { %vm1415_vm2 = vcmp.eq.f32.partialorder %v3081_v47, inf  ;;  %v1001_v42 = vadd.f32 %v1000_v28, %v3017_v53  ;;  %2244 = vtanh.f32 %v1576_v56  ;;  %vm1417_vm3 = vcmp.eq.f32.partialorder %v3081_v47, 0.0  ;;  %v2231_v7 = vpop.eup %2230  ;;  %v1797_v3 = vpop.permute.xlu1 %1796 }
 0x139   :  { %v1381_v63 = vsel %vm1380_vm11, %v3040_v21, %v1379_v15  ;;  %v1418_v18 = vand.u32 2147483648, %v3081_v47  ;;  %v1328_v12 = vsub.f32 %v2911_v36, %v1312_v30  ;;  %vm1757_vm4 = vcmp.eq.s32.totalorder %v2903_v59, %v2928_v57 }
 0x13a   :  { %v1579_v14 = vmul.f32 0.5, %v1563_v41  ;;  %v1384_v53 = vsel %vm1382_vm12, %v1383_v19, %v1381_v63  ;;  %v1402_v32 = vsel %vm1401_vm13, %v3042_v0, %v1400_v61  ;;  %v1315_v23 = vmul.f32 2.0, %v1169_v10  ;;  %v1792_v61 = vpop.permute.xlu0 %1791 }
 0x13b   :  { %v1562_v25 = vsub.f32 %v2995_v40, %v1384_v53  ;;  %v1405_v29 = vsel %vm1403_vm14, %v1404_v20, %v1402_v32  ;;  %v1393_v36 = vmul.f32 %v2231_v7, %v3062_v51  ;;  %v3152_v48 = vmax.f32 %v1328_v12, 0.0  ;;  %v2177_v32 = vpop.f32.mrf.mxu1 }
 0x13c   :  { %2246 = vtanh.f32 %v1579_v14  ;;  %v1565_v21 = vsub.f32 %v3008_v31, %v1405_v29  ;;  %v1331_v19 = vsub.f32 %v2913_v62, %v1315_v23  ;;  %v1163_v5 = vadd.f32 %v1162_v43, %v1001_v42  ;;  %v2151_v31 = vpop.f32.mrf.mxu0 }
 0x13d   :  { %v2233_v17 = vpop.eup %2232  ;;  %vm1760_vm5 = vcmp.eq.s32.totalorder %v2931_v35, %v2928_v57  ;;  %v1578_v40 = vmul.f32 0.5, %v1562_v25  ;;  %v1395_v0 = vsel %vm1394_vm15, %v3062_v51, %v1393_v36  ;;  %vm1408_vm6 = vcmp.eq.f32.partialorder %v3083_v54, inf  ;;  %v1807_v25 = vpop.permute.xlu1 %1806 }
 0x13e   :  { %2248 = vrsqrt.f32 %v3152_v48  ;;  %v2235_v20 = vpop.eup %2234  ;;  %v1607_v6 = vmul.f32 0.5, %v2233_v17  ;;  %v1581_v30 = vmul.f32 0.5, %v1565_v21  ;;  %v1398_v62 = vsel %vm1396_vm0, %v1397_v58, %v1395_v0  ;;  %v1012_v23 = vpop.f32.mrf.mxu0 }
 0x13f   :  { %vm1410_vm7 = vcmp.eq.f32.partialorder %v3083_v54, 0.0  ;;  %2250 = vtanh.f32 %v1578_v40  ;;  %v1564_v28 = vsub.f32 %v3026_v52, %v1398_v62  ;;  %v1414_v60 = vmul.f32 %v2235_v20, %v3081_v47  ;;  %v2237_v10 = vpop.eup %2236 }
 0x140   :  { %v1411_v37 = vand.u32 2147483648, %v3083_v54  ;;  %v1623_v27 = vadd.f32 0.5, %v1607_v6  ;;  %vm1759_vm8 = vcmp.eq.s32.totalorder %v2937_v24, %v2928_v57  ;;  %2252 = vtanh.f32 %v1581_v30  ;;  %v1802_v6 = vpop.permute.xlu0 %1801 }
 0x141   :  { %v3173_v56 = vmax.f32 %v1331_v19, 0.0  ;;  %v1314_v51 = vmul.f32 2.0, %v1163_v5  ;;  %v2239_v58 = vpop.eup %2238  ;;  %v1606_v45 = vmul.f32 0.5, %v2237_v10  ;;  %v1580_v15 = vmul.f32 0.5, %v1564_v28  ;;  %v1817_v35 = vpop.permute.xlu1 %1816 }
 0x142   :  { %v1416_v52 = vsel %vm1415_vm2, %v3081_v47, %v1414_v60  ;;  %v1019_v41 = vadd.f32 %v2151_v31, %v3020_v4  ;;  %v1870_v42 = vsel %vm1758_vm1, %v1797_v3, %v1623_v27  ;;  %v1407_v12 = vmul.f32 %v2239_v58, %v3083_v54  ;;  %v2241_v7 = vpop.eup %2240  ;;  %v1174_v31 = vpop.f32.mrf.mxu1 }
 0x143   :  { %v1419_v63 = vsel %vm1417_vm3, %v1418_v18, %v1416_v52  ;;  %2254 = vrsqrt.f32 %v3173_v56  ;;  %1886 = vst [vmem:[#allocation2 + $0x8] sm:$0xff] %v1870_v42  ;;  %v1622_v14 = vadd.f32 0.5, %v1606_v45  ;;  %vm1762_vm9 = vcmp.eq.s32.totalorder %v2953_v2, %v2928_v57 }
 0x144   :  { %2256 = vtanh.f32 %v1580_v15  ;;  %v1567_v4 = vsub.f32 %v3037_v55, %v1419_v63  ;;  %vm1429_vm10 = vcmp.eq.f32.partialorder %v3115_v49, inf  ;;  %v2243_v34 = vpop.eup %2242  ;;  %v1609_v53 = vmul.f32 0.5, %v2241_v7  ;;  %v1812_v24 = vpop.permute.xlu0 %1811 }
 0x145   :  { %v1409_v47 = vsel %vm1408_vm6, %v3083_v54, %v1407_v12  ;;  %vm1431_vm11 = vcmp.eq.f32.partialorder %v3115_v49, 0.0  ;;  %v1432_v18 = vand.u32 2147483648, %v3115_v49  ;;  %v1869_v29 = vsel %vm1757_vm4, %v1792_v61, %v1622_v14  ;;  %v2245_v21 = vpop.eup %2244  ;;  %v1827_v2 = vpop.permute.xlu1 %1826 }
 0x146   :  { %v1583_v55 = vmul.f32 0.5, %v1567_v4  ;;  %v1412_v36 = vsel %vm1410_vm7, %v1411_v37, %v1409_v47  ;;  %v1428_v43 = vmul.f32 %v2243_v34, %v3115_v49  ;;  %1885 = vst [vmem:[#allocation2] sm:$0xff] %v1869_v29  ;;  %v1625_v19 = vadd.f32 0.5, %v1609_v53 }
 0x147   :  { %vm1761_vm12 = vcmp.eq.s32.totalorder %v2960_v8, %v2928_v57  ;;  %v1566_v5 = vsub.f32 %v3050_v13, %v1412_v36  ;;  %v1330_v17 = vsub.f32 %v2915_v9, %v1314_v51  ;;  %v1181_v40 = vadd.f32 %v2177_v32, %v1019_v41 }
 0x148   :  { %v1608_v0 = vmul.f32 0.5, %v2245_v21  ;;  %vm1764_vm13 = vcmp.eq.s32.totalorder %v2963_v1, %v2928_v57  ;;  %2258 = vtanh.f32 %v1583_v55  ;;  %v1430_v54 = vsel %vm1429_vm10, %v3115_v49, %v1428_v43 }
 0x149   :  { %v1013_v20 = vadd.f32 %v1012_v23, %v3023_v33  ;;  %v1872_v30 = vsel %vm1760_vm5, %v1807_v25, %v1625_v19  ;;  %v1582_v13 = vmul.f32 0.5, %v1566_v5  ;;  %v1433_v9 = vsel %vm1431_vm11, %v1432_v18, %v1430_v54  ;;  %v2247_v3 = vpop.eup %2246  ;;  %v1822_v5 = vpop.permute.xlu0 %1821 }
 0x14a   :  { %v3216_v62 = vmax.f32 %v1330_v17, 0.0  ;;  %1888 = vst [vmem:[#allocation2 + $0x18] sm:$0xff] %v1872_v30  ;;  %v1624_v28 = vadd.f32 0.5, %v1608_v0  ;;  %v1569_v60 = vsub.f32 %v3067_v38, %v1433_v9  ;;  %v1317_v37 = vmul.f32 2.0, %v1181_v40  ;;  %v1837_v30 = vpop.permute.xlu1 %1836 }
 0x14b   :  { %v1175_v10 = vadd.f32 %v1174_v31, %v1013_v20  ;;  %v2249_v33 = vpop.eup %2248  ;;  %v1611_v27 = vmul.f32 0.5, %v2247_v3  ;;  %vm1763_vm14 = vcmp.eq.s32.totalorder %v2973_v46, %v2928_v57  ;;  %2260 = vtanh.f32 %v1582_v13 }
 0x14c   :  { %vm1422_vm15 = vcmp.eq.f32.partialorder %v3152_v48, inf  ;;  %v1871_v49 = vsel %vm1759_vm8, %v1802_v6, %v1624_v28  ;;  %v1585_v51 = vmul.f32 0.5, %v1569_v60  ;;  %v1421_v58 = vmul.f32 %v2249_v33, %v3152_v48  ;;  %v2251_v38 = vpop.eup %2250 }
 0x14d   :  { %2262 = vrsqrt.f32 %v3216_v62  ;;  %1887 = vst [vmem:[#allocation2 + $0x10] sm:$0xff] %v1871_v49  ;;  %v1627_v45 = vadd.f32 0.5, %v1611_v27  ;;  %v1425_v15 = vand.u32 2147483648, %v3152_v48  ;;  %v1333_v52 = vsub.f32 %v2917_v16, %v1317_v37  ;;  %v2253_v61 = vpop.eup %2252  ;;  %v1832_v60 = vpop.permute.xlu0 %1831 }
 0x14e   :  { %v1316_v41 = vmul.f32 2.0, %v1175_v10  ;;  %v1610_v42 = vmul.f32 0.5, %v2251_v38  ;;  %2264 = vtanh.f32 %v1585_v51  ;;  %v1423_v63 = vsel %vm1422_vm15, %v3152_v48, %v1421_v58  ;;  %v1847_v58 = vpop.permute.xlu1 %1846 }
 0x14f   :  { %vm1424_vm0 = vcmp.eq.f32.partialorder %v3152_v48, 0.0  ;;  %v1874_v12 = vsel %vm1762_vm9, %v1817_v35, %v1627_v45  ;;  %v1613_v7 = vmul.f32 0.5, %v2253_v61  ;;  %v3234_v4 = vmax.f32 %v1333_v52, 0.0 }
 0x150   :  { %v1426_v14 = vsel %vm1424_vm0, %v1425_v15, %v1423_v63  ;;  %v2255_v34 = vpop.eup %2254  ;;  %1890 = vst [vmem:[#allocation2 + $0x28] sm:$0xff] %v1874_v12  ;;  %v1626_v16 = vadd.f32 0.5, %v1610_v42  ;;  %v1668_v53 = vadd.s32 72, %v2903_v59  ;;  %v1332_v18 = vsub.f32 %v2919_v22, %v1316_v41 }
 0x151   :  { %v1568_v47 = vsub.f32 %v3085_v50, %v1426_v14  ;;  %v2257_v32 = vpop.eup %2256  ;;  %v1629_v48 = vadd.f32 0.5, %v1613_v7  ;;  %v1442_v23 = vmul.f32 %v2255_v34, %v3173_v56  ;;  %vm1443_vm1 = vcmp.eq.f32.partialorder %v3173_v56, inf }
 0x152   :  { %2266 = vrsqrt.f32 %v3234_v4  ;;  %v1873_v25 = vsel %vm1761_vm12, %v1812_v24, %v1626_v16  ;;  %v1612_v29 = vmul.f32 0.5, %v2257_v32  ;;  %v1446_v36 = vand.u32 2147483648, %v3173_v56  ;;  %v1842_v16 = vpop.permute.xlu0 %1841 }
 0x153   :  { %v1584_v55 = vmul.f32 0.5, %v1568_v47  ;;  %1889 = vst [vmem:[#allocation2 + $0x20] sm:$0xff] %v1873_v25  ;;  %v1876_v22 = vsel %vm1764_vm13, %v1827_v2, %v1629_v48  ;;  %v1444_v50 = vsel %vm1443_vm1, %v3173_v56, %v1442_v23  ;;  %vm1445_vm2 = vcmp.eq.f32.partialorder %v3173_v56, 0.0  ;;  %v1857_v25 = vpop.permute.xlu1 %1856 }
 0x154   :  { %v3251_v43 = vmax.f32 %v1332_v18, 0.0  ;;  %1892 = vst [vmem:[#allocation2 + $0x38] sm:$0xff] %v1876_v22  ;;  %v1628_v21 = vadd.f32 0.5, %v1612_v29  ;;  %v1447_v8 = vsel %vm1445_vm2, %v1446_v36, %v1444_v50  ;;  %v1667_v0 = vadd.s32 64, %v2903_v59 }
 0x155   :  { %2268 = vtanh.f32 %v1584_v55  ;;  %v2259_v19 = vpop.eup %2258  ;;  %v1571_v17 = vsub.f32 %v3101_v26, %v1447_v8  ;;  %vm1766_vm3 = vcmp.eq.s32.totalorder %v1668_v53, %v2928_v57  ;;  %v1670_v26 = vadd.s32 88, %v2903_v59 }
 0x156   :  { %2270 = vrsqrt.f32 %v3251_v43  ;;  %v1875_v1 = vsel %vm1763_vm14, %v1822_v5, %v1628_v21  ;;  %v1615_v40 = vmul.f32 0.5, %v2259_v19  ;;  %vm1765_vm4 = vcmp.eq.s32.totalorder %v1667_v0, %v2928_v57  ;;  %v1852_v21 = vpop.permute.xlu0 %1851 }
 0x157   :  { %1891 = vst [vmem:[#allocation2 + $0x30] sm:$0xff] %v1875_v1  ;;  %v1587_v56 = vmul.f32 0.5, %v1571_v17  ;;  %vm1436_vm5 = vcmp.eq.f32.partialorder %v3216_v62, inf  ;;  %v1439_v28 = vand.u32 2147483648, %v3216_v62  ;;  %vm1438_vm6 = vcmp.eq.f32.partialorder %v3216_v62, 0.0 }
 0x158   :  { %v2261_v54 = vpop.eup %2260  ;;  %v1631_v20 = vadd.f32 0.5, %v1615_v40  ;;  %vm1768_vm7 = vcmp.eq.s32.totalorder %v1670_v26, %v2928_v57  ;;  %v1669_v38 = vadd.s32 80, %v2903_v59  ;;  %vm1457_vm8 = vcmp.eq.f32.partialorder %v3234_v4, inf  ;;  %v1867_v40 = vpop.permute.xlu1 %1866 }
 0x159   :  { %v1614_v13 = vmul.f32 0.5, %v2261_v54  ;;  %2272 = vtanh.f32 %v1587_v56  ;;  %vm1459_vm9 = vcmp.eq.f32.partialorder %v3234_v4, 0.0  ;;  %v1672_v14 = vadd.s32 104, %v2903_v59 }
 0x15a   :  { %v2263_v6 = vpop.eup %2262  ;;  %v1878_v9 = vsel %vm1766_vm3, %v1837_v30, %v1631_v20  ;;  %vm1767_vm10 = vcmp.eq.s32.totalorder %v1669_v38, %v2928_v57  ;;  %vm1450_vm11 = vcmp.eq.f32.partialorder %v3251_v43, inf  ;;  %v1453_v34 = vand.u32 2147483648, %v3251_v43  ;;  %v1862_v20 = vpop.permute.xlu0 %1861 }
 0x15b   :  { %v1435_v46 = vmul.f32 %v2263_v6, %v3216_v62  ;;  %v2265_v31 = vpop.eup %2264  ;;  %1894 = vst [vmem:[#allocation2 + $0x48] sm:$0xff] %v1878_v9  ;;  %v1630_v3 = vadd.f32 0.5, %v1614_v13  ;;  %vm1452_vm12 = vcmp.eq.f32.partialorder %v3251_v43, 0.0  ;;  %vm1770_vm13 = vcmp.eq.s32.totalorder %v1672_v14, %v2928_v57 }
 0x15c   :  { %v1617_v37 = vmul.f32 0.5, %v2265_v31  ;;  %v1671_v55 = vadd.s32 96, %v2903_v59  ;;  %v1673_v5 = vadd.s32 112, %v2903_v59 }
 0x15d   :  { %v1437_v10 = vsel %vm1436_vm5, %v3216_v62, %v1435_v46  ;;  %v1877_v33 = vsel %vm1765_vm4, %v1832_v60, %v1630_v3  ;;  %v1460_v62 = vand.u32 2147483648, %v3234_v4 }
 0x15e   :  { %v1440_v27 = vsel %vm1438_vm6, %v1439_v28, %v1437_v10  ;;  %1893 = vst [vmem:[#allocation2 + $0x40] sm:$0xff] %v1877_v33  ;;  %v1633_v49 = vadd.f32 0.5, %v1617_v37  ;;  %vm1769_vm14 = vcmp.eq.s32.totalorder %v1671_v55, %v2928_v57  ;;  %vm1771_vm0 = vcmp.eq.s32.totalorder %v1673_v5, %v2928_v57 }
 0x15f   :  { %v2267_v35 = vpop.eup %2266  ;;  %v1570_v51 = vsub.f32 %v3117_v11, %v1440_v27 }
 0x160   :  { %v1456_v45 = vmul.f32 %v2267_v35, %v3234_v4  ;;  %v1880_v15 = vsel %vm1768_vm7, %v1847_v58, %v1633_v49 }
 0x161   :  { %v1586_v52 = vmul.f32 0.5, %v1570_v51  ;;  %1896 = vst [vmem:[#allocation2 + $0x58] sm:$0xff] %v1880_v15 }
 0x162   :  { %v2269_v41 = vpop.eup %2268  ;;  %v1458_v61 = vsel %vm1457_vm8, %v3234_v4, %v1456_v45 }
 0x163   :  { %v2271_v42 = vpop.eup %2270  ;;  %v1616_v63 = vmul.f32 0.5, %v2269_v41  ;;  %2274 = vtanh.f32 %v1586_v52  ;;  %v1461_v11 = vsel %vm1459_vm9, %v1460_v62, %v1458_v61 }
 0x164   :  { %v1573_v24 = vsub.f32 %v3133_v44, %v1461_v11  ;;  %v1449_v12 = vmul.f32 %v2271_v42, %v3251_v43 }
 0x165   :  { %v1632_v7 = vadd.f32 0.5, %v1616_v63 }
 0x166   :  { %v1589_v53 = vmul.f32 0.5, %v1573_v24  ;;  %v1451_v4 = vsel %vm1450_vm11, %v3251_v43, %v1449_v12  ;;  %v2273_v47 = vpop.eup %2272  ;;  %v1674_v43 = vadd.s32 120, %v2903_v59 }
 0x167   :  { %v1879_v18 = vsel %vm1767_vm10, %v1842_v16, %v1632_v7  ;;  %v1454_v32 = vsel %vm1452_vm12, %v1453_v34, %v1451_v4  ;;  %v1619_v44 = vmul.f32 0.5, %v2273_v47 }
 0x168   :  { %1895 = vst [vmem:[#allocation2 + $0x50] sm:$0xff] %v1879_v18  ;;  %2276 = vtanh.f32 %v1589_v53  ;;  %v1572_v48 = vsub.f32 %v3154_v39, %v1454_v32  ;;  %vm1772_vm15 = vcmp.eq.s32.totalorder %v1674_v43, %v2928_v57 }
 0x169   :  { %v1635_v23 = vadd.f32 0.5, %v1619_v44 }
 0x16a   :  { %v1588_v2 = vmul.f32 0.5, %v1572_v48 }
 0x16b   :  { %v1882_v29 = vsel %vm1770_vm13, %v1857_v25, %v1635_v23 }
 0x16c   :  { %2278 = vtanh.f32 %v1588_v2  ;;  %1898 = vst [vmem:[#allocation2 + $0x68] sm:$0xff] %v1882_v29 }
 0x170   :  { %v2275_v36 = vpop.eup %2274 }
 0x171   :  { %v1618_v22 = vmul.f32 0.5, %v2275_v36 }
 0x173   :  { %v1634_v50 = vadd.f32 0.5, %v1618_v22 }
 0x175   :  { %v2277_v8 = vpop.eup %2276  ;;  %v1881_v39 = vsel %vm1769_vm14, %v1852_v21, %v1634_v50 }
 0x176   :  { %1897 = vst [vmem:[#allocation2 + $0x60] sm:$0xff] %v1881_v39  ;;  %v1621_v19 = vmul.f32 0.5, %v2277_v8 }
 0x178   :  { %v1637_v17 = vadd.f32 0.5, %v1621_v19 }
 0x179   :  { %v2279_v1 = vpop.eup %2278 }
 0x17a   :  { %v1884_v0 = vsel %vm1772_vm15, %v1867_v40, %v1637_v17  ;;  %v1620_v56 = vmul.f32 0.5, %v2279_v1 }
 0x17b   :  { %1900 = vst [vmem:[#allocation2 + $0x78] sm:$0xff] %v1884_v0 }
 0x17c   :  { %v1636_v54 = vadd.f32 0.5, %v1620_v56 }
 0x17e   :  { %v1883_v6 = vsel %vm1771_vm0, %v1862_v20, %v1636_v54 }
 0x17f   :  { %1899 = vst [vmem:[#allocation2 + $0x70] sm:$0xff] %v1883_v6 }
 0x180   :  { %2291 = shalt.err (!%p2288_p4)
}
 0x181   :  { %s2304_s10 = smov 128   ;;  %s2305_s11 = smov 8  }
 0x182   :  { %1912 = dma.vmem_to_hbm [thread:$0]  %s1907_s9, 2048, %s3299_s5, [#allocation3], %s2304_s10, %s2304_s10, %s2305_s11  }
 0x183   :  { %2300 = dma.done.wait [#allocation3], 2048  }
 0x184   :  { %2301 = vsyncadd [#allocation3], 4294965248 }
 0x185   :  { %1916 = vsyncpa [#allocation3], 1 }

</bundles_post_ra>
